<compile_context>
chip_gen: v7x
topology: tpu7x:2x2x1
jax: 0.10.0
libtpu: 0.0.40
codegen_flags: <defaults>
</compile_context>

<pallas_src>
import functools

import jax
import jax.numpy as jnp
from jax.experimental import pallas as pl
from jax.experimental.pallas import tpu as pltpu

# Set to jnp.bfloat16 on v6e/v7x for ~2x MXU throughput and half the weight
# bytes (accumulation stays float32). Default float32 matches the reference.
MXU_DTYPE = jnp.float32


def _mdot(a, b):
    return jnp.dot(a.astype(MXU_DTYPE), b.astype(MXU_DTYPE),
                   preferred_element_type=jnp.float32)


# ----------------------------------------------------------------------------
# Kernel 1: tiled linear  y = x @ W + b  (M tiled, weights single block).
# Used for the hoisted input projections (both LSTM directions fused) and the
# decoder teacher-forced embedding projection.
# ----------------------------------------------------------------------------
def _linear_kernel(x_ref, w_ref, b_ref, o_ref):
    o_ref[...] = _mdot(x_ref[...], w_ref[...]) + b_ref[...]


def linear(x2d, w_t, b2d, *, block_m=256):
    M, Kin = x2d.shape
    N = w_t.shape[1]
    bm = min(block_m, M)
    return pl.pallas_call(
        _linear_kernel,
        out_shape=jax.ShapeDtypeStruct((M, N), jnp.float32),
        grid_spec=pltpu.PrefetchScalarGridSpec(
            num_scalar_prefetch=0,
            grid=(pl.cdiv(M, bm),),
            in_specs=[
                pl.BlockSpec((bm, Kin), lambda i: (i, 0)),
                pl.BlockSpec((Kin, N), lambda i: (0, 0)),
                pl.BlockSpec((1, N), lambda i: (0, 0)),
            ],
            out_specs=pl.BlockSpec((bm, N), lambda i: (i, 0)),
        ),
        compiler_params=pltpu.CompilerParams(dimension_semantics=("parallel",)),
    )(x2d, w_t, b2d)


# ----------------------------------------------------------------------------
# Kernel 2: unidirectional LSTM recurrence over the full sequence.
# grid=(2,) runs the two directions in parallel (one per TensorCore on v7x).
# The input projection (x @ W_ih + b) is precomputed outside; only h @ W_hh
# remains in the loop.  State is carried in the fori_loop carry (vregs).
# ----------------------------------------------------------------------------
def _lstm_dir_kernel(xg_ref, whh_ref, out_ref, *, hidden):
    t_len = xg_ref.shape[0]
    batch = xg_ref.shape[1]
    whh = whh_ref[...]

    def step(t, carry):
        h, c = carry
        gates = xg_ref[t] + _mdot(h, whh)               # (B, 4H), order i,f,g,o
        i = jax.nn.sigmoid(gates[:, 0 * hidden:1 * hidden])
        f = jax.nn.sigmoid(gates[:, 1 * hidden:2 * hidden])
        g = jnp.tanh(gates[:, 2 * hidden:3 * hidden])
        o = jax.nn.sigmoid(gates[:, 3 * hidden:4 * hidden])
        c_new = f * c + i * g
        h_new = o * jnp.tanh(c_new)
        out_ref[t] = h_new
        return h_new, c_new

    h0 = jnp.zeros((batch, hidden), jnp.float32)
    c0 = jnp.zeros((batch, hidden), jnp.float32)
    jax.lax.fori_loop(0, t_len, step, (h0, c0))


def bilstm_tm(x_tm, p, hidden):
    """Bidirectional LSTM, time-major (T, B, F) -> (T, B, 2H)."""
    T, B, I = x_tm.shape
    # Hoisted input projection, both directions in ONE big GEMM.
    wih = jnp.concatenate([p["wih_f"], p["wih_b"]], axis=1)       # (I, 8H)
    b = jnp.concatenate([p["b_f"], p["b_b"]], axis=1)             # (1, 8H)
    xg_all = linear(x_tm.reshape(T * B, I), wih, b).reshape(T, B, 8 * hidden)
    xg_f = xg_all[..., :4 * hidden]
    xg_b = xg_all[..., 4 * hidden:]
    xg = jnp.stack([xg_f, xg_b[::-1]], axis=0)                    # (2, T, B, 4H)
    whh = jnp.stack([p["whh_f"], p["whh_b"]], axis=0)             # (2, H, 4H)

    out = pl.pallas_call(
        functools.partial(_lstm_dir_kernel, hidden=hidden),
        out_shape=jax.ShapeDtypeStruct((2, T, B, hidden), jnp.float32),
        grid_spec=pltpu.PrefetchScalarGridSpec(
            num_scalar_prefetch=0,
            grid=(2,),
            in_specs=[
                pl.BlockSpec((None, T, B, 4 * hidden), lambda d: (d, 0, 0, 0)),
                pl.BlockSpec((None, hidden, 4 * hidden), lambda d: (d, 0, 0)),
            ],
            out_specs=pl.BlockSpec((None, T, B, hidden), lambda d: (d, 0, 0, 0)),
        ),
        compiler_params=pltpu.CompilerParams(dimension_semantics=("parallel",)),
    )(xg, whh)

    fwd = out[0]
    bwd = out[1][::-1]
    return jnp.concatenate([fwd, bwd], axis=-1)                   # (T, B, 2H)


# ----------------------------------------------------------------------------
# Kernel 3: fused listener projection  kv = (x @ W_fc1 + b) @ [W_key | W_val] + b
# fc never round-trips through HBM; key and value come from a single GEMM.
# ----------------------------------------------------------------------------
def _listener_proj_kernel(x_ref, w1_ref, b1_ref, wkv_ref, bkv_ref, o_ref):
    fc = _mdot(x_ref[...], w1_ref[...]) + b1_ref[...]
    o_ref[...] = _mdot(fc, wkv_ref[...]) + bkv_ref[...]


def listener_proj(x2d, w1, b1, wkv, bkv, *, block_m=256):
    M, F2 = x2d.shape
    H = w1.shape[1]
    KV = wkv.shape[1]
    bm = min(block_m, M)
    return pl.pallas_call(
        _listener_proj_kernel,
        out_shape=jax.ShapeDtypeStruct((M, KV), jnp.float32),
        grid_spec=pltpu.PrefetchScalarGridSpec(
            num_scalar_prefetch=0,
            grid=(pl.cdiv(M, bm),),
            in_specs=[
                pl.BlockSpec((bm, F2), lambda i: (i, 0)),
                pl.BlockSpec((F2, H), lambda i: (0, 0)),
                pl.BlockSpec((1, H), lambda i: (0, 0)),
                pl.BlockSpec((H, KV), lambda i: (0, 0)),
                pl.BlockSpec((1, KV), lambda i: (0, 0)),
            ],
            out_specs=pl.BlockSpec((bm, KV), lambda i: (i, 0)),
        ),
        compiler_params=pltpu.CompilerParams(dimension_semantics=("parallel",)),
    )(x2d, w1, b1, wkv, bkv)


# ----------------------------------------------------------------------------
# Kernel 4: fused Speller decode — single pallas_call, in-kernel fori_loop over
# decode steps.  Two LSTMCells (fused GEMMs) + masked-softmax attention on the
# MXU + character projection per step.  Teacher-forced embedding projection
# (char_embed @ W1_e + b1) is precomputed outside and streamed in as `embg`.
# ----------------------------------------------------------------------------
def _decoder_kernel(embg_ref, key_ref, val_ref, lens_ref,
                    w1ch_ref, w2_ref, b2_ref, wcp_ref, bcp_ref,
                    out_ref, *, hidden):
    n_steps = embg_ref.shape[0]
    batch = key_ref.shape[0]
    seq = key_ref.shape[1]

    key = key_ref[...]                     # (B, S, K), resident for all steps
    val = val_ref[...]                     # (B, S, V)
    w1ch = w1ch_ref[...]                   # (K+H, 4H)  rows = [W1_ctx ; W1_hh]
    w2 = w2_ref[...]                       # (2H, 4H)   rows = [W2_ih ; W2_hh]
    b2 = b2_ref[...]
    wcp = wcp_ref[...]                     # (H+V, N)   rows = [Wcp_h ; Wcp_ctx]
    bcp = bcp_ref[...]

    # Step-invariant attention mask; -1e-09 reproduces the reference exactly.
    pos = jax.lax.broadcasted_iota(jnp.int32, (batch, seq), 1)
    mask = pos >= lens_ref[...]            # lens: (B, 1) int32

    def gates_to_hc(gates, c_prev):
        i = jax.nn.sigmoid(gates[:, 0 * hidden:1 * hidden])
        f = jax.nn.sigmoid(gates[:, 1 * hidden:2 * hidden])
        g = jnp.tanh(gates[:, 2 * hidden:3 * hidden])
        o = jax.nn.sigmoid(gates[:, 3 * hidden:4 * hidden])
        c_new = f * c_prev + i * g
        return o * jnp.tanh(c_new), c_new

    def step(t, carry):
        h0, c0, h1, c1, ctx = carry
        # LSTMCell 1: emb part + bias hoisted into embg; [ctx | h0] fused GEMM.
        g1 = embg_ref[t] + _mdot(jnp.concatenate([ctx, h0], axis=1), w1ch)
        h0n, c0n = gates_to_hc(g1, c0)
        # LSTMCell 2: [h0n | h1] fused GEMM.
        g2 = _mdot(jnp.concatenate([h0n, h1], axis=1), w2) + b2
        h1n, c1n = gates_to_hc(g2, c1)
        # Attention: MXU contractions (flash-style batched einsum).
        energy = jnp.einsum('bqk,bsk->bqs', h1n[:, None, :], key,
                            preferred_element_type=jnp.float32)[:, 0, :]
        energy = jnp.where(mask, jnp.float32(-1e-09), energy)
        attn = jax.nn.softmax(energy, axis=1)
        ctx_new = jnp.einsum('bqs,bsv->bqv', attn[:, None, :], val,
                             preferred_element_type=jnp.float32)[:, 0, :]
        # character_prob(cat(hidden_1, context)) — fused GEMM.
        out_ref[t] = _mdot(jnp.concatenate([h1n, ctx_new], axis=1), wcp) + bcp
        return h0n, c0n, h1n, c1n, ctx_new

    h_init = jnp.zeros((batch, hidden), jnp.float32)
    ctx0 = key[:, 0, :]                    # reference: context = key[:, 0, :]
    jax.lax.fori_loop(0, n_steps, step,
                      (h_init, jnp.zeros_like(h_init),
                       jnp.zeros_like(h_init), jnp.zeros_like(h_init), ctx0))


def decoder_call(embg, key, value, lens2d, w1ch, w2, b2, wcp, bcp,
                 hidden, num_embeds):
    L, B, _ = embg.shape
    return pl.pallas_call(
        functools.partial(_decoder_kernel, hidden=hidden),
        out_shape=jax.ShapeDtypeStruct((L, B, num_embeds), jnp.float32),
    )(embg, key, value, lens2d, w1ch, w2, b2, wcp, bcp)


# ----------------------------------------------------------------------------
# Glue: time-major pyramidal pooling, parameter init, full forward.
# ----------------------------------------------------------------------------
def reshape_and_pool_tm(x_tm, lens):
    """Halve sequence length by averaging adjacent frames (time-major)."""
    T, B, F = x_tm.shape
    if T % 2 == 1:
        x_tm = x_tm[:-1]
        lens = lens - 1
        T -= 1
    x_tm = x_tm.reshape(T // 2, 2, B, F).mean(axis=1)
    return x_tm, lens // 2


def init_params(rng, input_dim, hidden_dim, key_dim, value_dim,
                num_embeds, emb_dim, dec_hidden):
    keys = list(jax.random.split(rng, 64))
    it = iter(keys)

    def w(shape, scale=0.1):
        return jax.random.normal(next(it), shape, jnp.float32) * scale

    def bilstm_params(in_dim, hid):
        return dict(
            wih_f=w((in_dim, 4 * hid)), whh_f=w((hid, 4 * hid)), b_f=w((1, 4 * hid)),
            wih_b=w((in_dim, 4 * hid)), whh_b=w((hid, 4 * hid)), b_b=w((1, 4 * hid)),
        )

    emb = w((num_embeds, emb_dim), 0.5)
    emb = emb.at[0].set(0.0)  # padding_idx=0

    return dict(
        init=bilstm_params(input_dim, hidden_dim),
        pb1=bilstm_params(2 * hidden_dim, hidden_dim),
        pb2=bilstm_params(2 * hidden_dim, hidden_dim),
        pb3=bilstm_params(2 * hidden_dim, hidden_dim),
        fc1_w=w((2 * hidden_dim, hidden_dim)), fc1_b=w((1, hidden_dim)),
        key_w=w((hidden_dim, key_dim)), key_b=w((1, key_dim)),
        val_w=w((hidden_dim, value_dim)), val_b=w((1, value_dim)),
        emb=emb,
        w1ih_e=w((emb_dim, 4 * dec_hidden)), w1ih_c=w((key_dim, 4 * dec_hidden)),
        w1hh=w((dec_hidden, 4 * dec_hidden)), b1=w((1, 4 * dec_hidden)),
        w2ih=w((dec_hidden, 4 * dec_hidden)), w2hh=w((dec_hidden, 4 * dec_hidden)),
        b2=w((1, 4 * dec_hidden)),
        wcp_h=w((dec_hidden, num_embeds)), wcp_c=w((value_dim, num_embeds)),
        bcp=w((1, num_embeds)),   # 2-D: fixes previous 1-D BlockSpec mismatch
    )


def seq2seq_forward(params, x, x_len, dec, hidden_dim, dec_hidden, num_embeds):
    B = x.shape[0]

    # ---- Listener (encoder): time-major throughout; transpose only at edges.
    h = jnp.transpose(x, (1, 0, 2))                      # (T, B, F)
    lens = x_len
    h = bilstm_tm(h, params["init"], hidden_dim)
    h, lens = reshape_and_pool_tm(h, lens)
    h = bilstm_tm(h, params["pb1"], hidden_dim)
    h, lens = reshape_and_pool_tm(h, lens)
    h = bilstm_tm(h, params["pb2"], hidden_dim)
    h, lens = reshape_and_pool_tm(h, lens)
    h = bilstm_tm(h, params["pb3"], hidden_dim)          # (S, B, 2H)

    S, _, F2 = h.shape
    K = params["key_w"].shape[1]
    wkv = jnp.concatenate([params["key_w"], params["val_w"]], axis=1)   # (H, K+V)
    bkv = jnp.concatenate([params["key_b"], params["val_b"]], axis=1)   # (1, K+V)
    kv = listener_proj(h.reshape(S * B, F2), params["fc1_w"], params["fc1_b"],
                       wkv, bkv)
    kv = jnp.transpose(kv.reshape(S, B, -1), (1, 0, 2))                 # (B, S, K+V)
    key, value = kv[..., :K], kv[..., K:]

    # ---- Speller (decoder): hoist teacher-forced embedding projection.
    L = dec.shape[1]
    E = params["emb"].shape[1]
    emb = params["emb"][dec]                                   # (B, L, E)
    emb_t = jnp.transpose(emb, (1, 0, 2)).reshape(L * B, E)
    embg = linear(emb_t, params["w1ih_e"], params["b1"]).reshape(L, B, 4 * dec_hidden)

    w1ch = jnp.concatenate([params["w1ih_c"], params["w1hh"]], axis=0)  # (K+H, 4H)
    w2 = jnp.concatenate([params["w2ih"], params["w2hh"]], axis=0)      # (2H, 4H)
    wcp = jnp.concatenate([params["wcp_h"], params["wcp_c"]], axis=0)   # (H+V, N)

    lens2d = lens.reshape(B, 1).astype(jnp.int32)
    preds = decoder_call(embg, key, value, lens2d, w1ch, w2, params["b2"],
                         wcp, params["bcp"], dec_hidden, num_embeds)    # (L, B, N)
    return jnp.transpose(preds, (1, 0, 2))                              # (B, L, N)


if __name__ == "__main__":
    INPUT_DIM = 8
    HIDDEN_DIM = 32                  # Listener hidden
    KEY_DIM = VALUE_DIM = 32         # must equal decoder hidden for consistency
    NUM_EMBEDS = 30
    EMB_DIM = 16
    DEC_HIDDEN = 32
    B, T, L = 2, 16, 8               # T divisible by 8 (three pyramidal poolings)

    assert KEY_DIM == VALUE_DIM == DEC_HIDDEN

    root = jax.random.PRNGKey(0)
    k_par, k_x, k_dec = jax.random.split(root, 3)

    params = init_params(k_par, INPUT_DIM, HIDDEN_DIM, KEY_DIM, VALUE_DIM,
                         NUM_EMBEDS, EMB_DIM, DEC_HIDDEN)

    x = jax.random.normal(k_x, (B, T, INPUT_DIM), jnp.float32)
    x_len = jnp.array([T, T], dtype=jnp.int32)     # full-length sequences
    dec = jax.random.randint(k_dec, (B, L), 1, NUM_EMBEDS, dtype=jnp.int32)

    fwd = jax.jit(functools.partial(seq2seq_forward,
                                    hidden_dim=HIDDEN_DIM,
                                    dec_hidden=DEC_HIDDEN,
                                    num_embeds=NUM_EMBEDS))
    preds = fwd(params, x, x_len, dec)
    preds = jax.block_until_ready(preds)
    assert preds.shape == (B, L, NUM_EMBEDS), preds.shape
    assert bool(jnp.all(jnp.isfinite(preds)))
    print("KERNEL_OK")
</pallas_src>

<mosaic_0001>
module attributes {stable_mosaic.version = 11 : i64} {
  func.func @_linear_kernel(%arg0: i32, %arg1: memref<32x8xf32, #tpu.memory_space<vmem>>, %arg2: memref<8x256xf32, #tpu.memory_space<vmem>>, %arg3: memref<1x256xf32, #tpu.memory_space<vmem>>, %arg4: memref<32x256xf32, #tpu.memory_space<vmem>>) attributes {dimension_semantics = [#tpu.dimension_semantics<parallel>], iteration_bounds = array<i64: 1>, scalar_prefetch = 0 : i64, scratch_operands = 0 : i64, tpu.core_type = #tpu.core_type<tc>, window_params = [{transform_indices = @transform_0, window_bounds = array<i64: 32, 8>}, {pipeline_mode = #tpu.pipeline_mode<synchronous>, transform_indices = @transform_1, window_bounds = array<i64: 8, 256>}, {pipeline_mode = #tpu.pipeline_mode<synchronous>, transform_indices = @transform_2, window_bounds = array<i64: 1, 256>}, {transform_indices = @transform_3, window_bounds = array<i64: 32, 256>}]} {
    %c0 = arith.constant 0 : index
    %c0_0 = arith.constant 0 : index
    %0 = vector.load %arg1[%c0, %c0_0] : memref<32x8xf32, #tpu.memory_space<vmem>>, vector<32x8xf32>
    %c0_1 = arith.constant 0 : index
    %c0_2 = arith.constant 0 : index
    %1 = vector.load %arg2[%c0_1, %c0_2] : memref<8x256xf32, #tpu.memory_space<vmem>>, vector<8x256xf32>
    %cst = arith.constant dense<0.000000e+00> : vector<32x256xf32>
    %2 = tpu.matmul %0, %1, %cst {dimension_numbers = #tpu.dot_dimension_numbers<[1], [0], [0], [1], [0, 0, 1, 1], [], []>} : vector<32x8xf32>, vector<8x256xf32>, vector<32x256xf32> -> vector<32x256xf32>
    %c0_3 = arith.constant 0 : index
    %c0_4 = arith.constant 0 : index
    %3 = vector.load %arg3[%c0_3, %c0_4] : memref<1x256xf32, #tpu.memory_space<vmem>>, vector<1x256xf32>
    %4 = vector.broadcast %3 : vector<1x256xf32> to vector<32x256xf32>
    %5 = arith.addf %2, %4 : vector<32x256xf32>
    %c0_5 = arith.constant 0 : index
    %c0_6 = arith.constant 0 : index
    %6 = vector.load %arg4[%c0_5, %c0_6] : memref<32x256xf32, #tpu.memory_space<vmem>>, vector<32x256xf32>
    tpu.vector_store %arg4[%c0_5, %c0_6], %5 {strides = array<i32>} : memref<32x256xf32, #tpu.memory_space<vmem>>, vector<32x256xf32>,
    return
  }
  func.func @transform_0(%arg0: i32) -> (i32, i32) {
    %c0_i32 = arith.constant 0 : i32
    %c0_i32_0 = arith.constant 0 : i32
    return %arg0, %c0_i32 : i32, i32
  }
  func.func @transform_1(%arg0: i32) -> (i32, i32) {
    %c0_i32 = arith.constant 0 : i32
    %c0_i32_0 = arith.constant 0 : i32
    %c0_i32_1 = arith.constant 0 : i32
    return %c0_i32, %c0_i32_0 : i32, i32
  }
  func.func @transform_2(%arg0: i32) -> (i32, i32) {
    %c0_i32 = arith.constant 0 : i32
    %c0_i32_0 = arith.constant 0 : i32
    %c0_i32_1 = arith.constant 0 : i32
    return %c0_i32, %c0_i32_0 : i32, i32
  }
  func.func @transform_3(%arg0: i32) -> (i32, i32) {
    %c0_i32 = arith.constant 0 : i32
    %c0_i32_0 = arith.constant 0 : i32
    return %arg0, %c0_i32 : i32, i32
  }
}

module attributes {stable_mosaic.version = 11 : i64} {
  func.func @_lstm_dir_kernel(%arg0: i32, %arg1: memref<1x16x2x128xf32, #tpu.memory_space<vmem>>, %arg2: memref<1x32x128xf32, #tpu.memory_space<vmem>>, %arg3: memref<1x16x2x32xf32, #tpu.memory_space<vmem>>) attributes {dimension_semantics = [#tpu.dimension_semantics<parallel>], iteration_bounds = array<i64: 2>, scalar_prefetch = 0 : i64, scratch_operands = 0 : i64, tpu.core_type = #tpu.core_type<tc>, window_params = [{transform_indices = @transform_0, window_bounds = array<i64: 1, 16, 2, 128>}, {transform_indices = @transform_1, window_bounds = array<i64: 1, 32, 128>}, {transform_indices = @transform_2, window_bounds = array<i64: 1, 16, 2, 32>}]} {
    %c0 = arith.constant 0 : index
    %c0_0 = arith.constant 0 : index
    %c0_1 = arith.constant 0 : index
    %0 = vector.load %arg2[%c0, %c0_0, %c0_1] : memref<1x32x128xf32, #tpu.memory_space<vmem>>, vector<1x32x128xf32>
    %1 = vector.shape_cast %0 : vector<1x32x128xf32> to vector<32x128xf32>
    %cst = arith.constant 0.000000e+00 : f32
    %2 = vector.broadcast %cst : f32 to vector<2x32xf32>
    %cst_2 = arith.constant 0.000000e+00 : f32
    %3 = vector.broadcast %cst_2 : f32 to vector<2x32xf32>
    %c0_i32 = arith.constant 0 : i32
    %c16_i32 = arith.constant 16 : i32
    %4 = arith.addi %c0_i32, %c16_i32 : i32
    %c1_i32 = arith.constant 1 : i32
    %5:2 = scf.for %arg4 = %c0_i32 to %4 step %c1_i32 iter_args(%arg5 = %2, %arg6 = %3) -> (vector<2x32xf32>, vector<2x32xf32>)  : i32 {
      %c0_4 = arith.constant 0 : index
      %6 = arith.index_cast %arg4 : i32 to index
      %c0_5 = arith.constant 0 : index
      %c0_6 = arith.constant 0 : index
      %7 = vector.load %arg1[%c0_4, %6, %c0_5, %c0_6] : memref<1x16x2x128xf32, #tpu.memory_space<vmem>>, vector<1x1x2x128xf32>
      %8 = vector.shape_cast %7 : vector<1x1x2x128xf32> to vector<2x128xf32>
      %cst_7 = arith.constant dense<0.000000e+00> : vector<2x128xf32>
      %9 = tpu.matmul %arg5, %1, %cst_7 {dimension_numbers = #tpu.dot_dimension_numbers<[1], [0], [0], [1], [0, 0, 1, 1], [], []>} : vector<2x32xf32>, vector<32x128xf32>, vector<2x128xf32> -> vector<2x128xf32>
      %10 = arith.addf %8, %9 : vector<2x128xf32>
      %11 = vector.extract_strided_slice %10 {offsets = [0, 0], sizes = [2, 32], strides = [1, 1]} : vector<2x128xf32> to vector<2x32xf32>
      %12 = arith.negf %11 : vector<2x32xf32>
      %13 = math.exp %12 : vector<2x32xf32>
      %cst_8 = arith.constant 1.000000e+00 : f32
      %14 = vector.broadcast %cst_8 : f32 to vector<2x32xf32>
      %15 = arith.addf %14, %13 : vector<2x32xf32>
      %16 = arith.divf %14, %15 : vector<2x32xf32>
      %17 = vector.extract_strided_slice %10 {offsets = [0, 32], sizes = [2, 32], strides = [1, 1]} : vector<2x128xf32> to vector<2x32xf32>
      %18 = arith.negf %17 : vector<2x32xf32>
      %19 = math.exp %18 : vector<2x32xf32>
      %cst_9 = arith.constant 1.000000e+00 : f32
      %20 = vector.broadcast %cst_9 : f32 to vector<2x32xf32>
      %21 = arith.addf %20, %19 : vector<2x32xf32>
      %22 = arith.divf %20, %21 : vector<2x32xf32>
      %23 = vector.extract_strided_slice %10 {offsets = [0, 64], sizes = [2, 32], strides = [1, 1]} : vector<2x128xf32> to vector<2x32xf32>
      %24 = math.tanh %23 : vector<2x32xf32>
      %25 = vector.extract_strided_slice %10 {offsets = [0, 96], sizes = [2, 32], strides = [1, 1]} : vector<2x128xf32> to vector<2x32xf32>
      %26 = arith.negf %25 : vector<2x32xf32>
      %27 = math.exp %26 : vector<2x32xf32>
      %cst_10 = arith.constant 1.000000e+00 : f32
      %28 = vector.broadcast %cst_10 : f32 to vector<2x32xf32>
      %29 = arith.addf %28, %27 : vector<2x32xf32>
      %30 = arith.divf %28, %29 : vector<2x32xf32>
      %31 = arith.mulf %22, %arg6 : vector<2x32xf32>
      %32 = arith.mulf %16, %24 : vector<2x32xf32>
      %33 = arith.addf %31, %32 : vector<2x32xf32>
      %34 = math.tanh %33 : vector<2x32xf32>
      %35 = arith.mulf %30, %34 : vector<2x32xf32>
      %c0_11 = arith.constant 0 : index
      %36 = arith.index_cast %arg4 : i32 to index
      %c0_12 = arith.constant 0 : index
      %c0_13 = arith.constant 0 : index
      %37 = vector.load %arg3[%c0_11, %36, %c0_12, %c0_13] : memref<1x16x2x32xf32, #tpu.memory_space<vmem>>, vector<1x1x2x32xf32>
      %38 = vector.shape_cast %37 : vector<1x1x2x32xf32> to vector<2x32xf32>
      %39 = vector.shape_cast %35 : vector<2x32xf32> to vector<1x1x2x32xf32>
      tpu.vector_store %arg3[%c0_11, %36, %c0_12, %c0_13], %39 {strides = array<i32>} : memref<1x16x2x32xf32, #tpu.memory_space<vmem>>, vector<1x1x2x32xf32>,
      scf.yield %35, %33 : vector<2x32xf32>, vector<2x32xf32>
    }
    %c16_i32_3 = arith.constant 16 : i32
    return
  }
  func.func @transform_0(%arg0: i32) -> (i32, i32, i32, i32) {
    %c0_i32 = arith.constant 0 : i32
    %c0_i32_0 = arith.constant 0 : i32
    %c0_i32_1 = arith.constant 0 : i32
    %c0_i32_2 = arith.constant 0 : i32
    return %arg0, %c0_i32, %c0_i32_0, %c0_i32_1 : i32, i32, i32, i32
  }
  func.func @transform_1(%arg0: i32) -> (i32, i32, i32) {
    %c0_i32 = arith.constant 0 : i32
    %c0_i32_0 = arith.constant 0 : i32
    %c0_i32_1 = arith.constant 0 : i32
    return %arg0, %c0_i32, %c0_i32_0 : i32, i32, i32
  }
  func.func @transform_2(%arg0: i32) -> (i32, i32, i32, i32) {
    %c0_i32 = arith.constant 0 : i32
    %c0_i32_0 = arith.constant 0 : i32
    %c0_i32_1 = arith.constant 0 : i32
    %c0_i32_2 = arith.constant 0 : i32
    return %arg0, %c0_i32, %c0_i32_0, %c0_i32_1 : i32, i32, i32, i32
  }
}

module attributes {stable_mosaic.version = 11 : i64} {
  func.func @_linear_kernel(%arg0: i32, %arg1: memref<16x64xf32, #tpu.memory_space<vmem>>, %arg2: memref<64x256xf32, #tpu.memory_space<vmem>>, %arg3: memref<1x256xf32, #tpu.memory_space<vmem>>, %arg4: memref<16x256xf32, #tpu.memory_space<vmem>>) attributes {dimension_semantics = [#tpu.dimension_semantics<parallel>], iteration_bounds = array<i64: 1>, scalar_prefetch = 0 : i64, scratch_operands = 0 : i64, tpu.core_type = #tpu.core_type<tc>, window_params = [{transform_indices = @transform_0, window_bounds = array<i64: 16, 64>}, {pipeline_mode = #tpu.pipeline_mode<synchronous>, transform_indices = @transform_1, window_bounds = array<i64: 64, 256>}, {pipeline_mode = #tpu.pipeline_mode<synchronous>, transform_indices = @transform_2, window_bounds = array<i64: 1, 256>}, {transform_indices = @transform_3, window_bounds = array<i64: 16, 256>}]} {
    %c0 = arith.constant 0 : index
    %c0_0 = arith.constant 0 : index
    %0 = vector.load %arg1[%c0, %c0_0] : memref<16x64xf32, #tpu.memory_space<vmem>>, vector<16x64xf32>
    %c0_1 = arith.constant 0 : index
    %c0_2 = arith.constant 0 : index
    %1 = vector.load %arg2[%c0_1, %c0_2] : memref<64x256xf32, #tpu.memory_space<vmem>>, vector<64x256xf32>
    %cst = arith.constant dense<0.000000e+00> : vector<16x256xf32>
    %2 = tpu.matmul %0, %1, %cst {dimension_numbers = #tpu.dot_dimension_numbers<[1], [0], [0], [1], [0, 0, 1, 1], [], []>} : vector<16x64xf32>, vector<64x256xf32>, vector<16x256xf32> -> vector<16x256xf32>
    %c0_3 = arith.constant 0 : index
    %c0_4 = arith.constant 0 : index
    %3 = vector.load %arg3[%c0_3, %c0_4] : memref<1x256xf32, #tpu.memory_space<vmem>>, vector<1x256xf32>
    %4 = vector.broadcast %3 : vector<1x256xf32> to vector<16x256xf32>
    %5 = arith.addf %2, %4 : vector<16x256xf32>
    %c0_5 = arith.constant 0 : index
    %c0_6 = arith.constant 0 : index
    %6 = vector.load %arg4[%c0_5, %c0_6] : memref<16x256xf32, #tpu.memory_space<vmem>>, vector<16x256xf32>
    tpu.vector_store %arg4[%c0_5, %c0_6], %5 {strides = array<i32>} : memref<16x256xf32, #tpu.memory_space<vmem>>, vector<16x256xf32>,
    return
  }
  func.func @transform_0(%arg0: i32) -> (i32, i32) {
    %c0_i32 = arith.constant 0 : i32
    %c0_i32_0 = arith.constant 0 : i32
    return %arg0, %c0_i32 : i32, i32
  }
  func.func @transform_1(%arg0: i32) -> (i32, i32) {
    %c0_i32 = arith.constant 0 : i32
    %c0_i32_0 = arith.constant 0 : i32
    %c0_i32_1 = arith.constant 0 : i32
    return %c0_i32, %c0_i32_0 : i32, i32
  }
  func.func @transform_2(%arg0: i32) -> (i32, i32) {
    %c0_i32 = arith.constant 0 : i32
    %c0_i32_0 = arith.constant 0 : i32
    %c0_i32_1 = arith.constant 0 : i32
    return %c0_i32, %c0_i32_0 : i32, i32
  }
  func.func @transform_3(%arg0: i32) -> (i32, i32) {
    %c0_i32 = arith.constant 0 : i32
    %c0_i32_0 = arith.constant 0 : i32
    return %arg0, %c0_i32 : i32, i32
  }
}

module attributes {stable_mosaic.version = 11 : i64} {
  func.func @_lstm_dir_kernel(%arg0: i32, %arg1: memref<1x8x2x128xf32, #tpu.memory_space<vmem>>, %arg2: memref<1x32x128xf32, #tpu.memory_space<vmem>>, %arg3: memref<1x8x2x32xf32, #tpu.memory_space<vmem>>) attributes {dimension_semantics = [#tpu.dimension_semantics<parallel>], iteration_bounds = array<i64: 2>, scalar_prefetch = 0 : i64, scratch_operands = 0 : i64, tpu.core_type = #tpu.core_type<tc>, window_params = [{transform_indices = @transform_0, window_bounds = array<i64: 1, 8, 2, 128>}, {transform_indices = @transform_1, window_bounds = array<i64: 1, 32, 128>}, {transform_indices = @transform_2, window_bounds = array<i64: 1, 8, 2, 32>}]} {
    %c0 = arith.constant 0 : index
    %c0_0 = arith.constant 0 : index
    %c0_1 = arith.constant 0 : index
    %0 = vector.load %arg2[%c0, %c0_0, %c0_1] : memref<1x32x128xf32, #tpu.memory_space<vmem>>, vector<1x32x128xf32>
    %1 = vector.shape_cast %0 : vector<1x32x128xf32> to vector<32x128xf32>
    %cst = arith.constant 0.000000e+00 : f32
    %2 = vector.broadcast %cst : f32 to vector<2x32xf32>
    %cst_2 = arith.constant 0.000000e+00 : f32
    %3 = vector.broadcast %cst_2 : f32 to vector<2x32xf32>
    %c0_i32 = arith.constant 0 : i32
    %c8_i32 = arith.constant 8 : i32
    %4 = arith.addi %c0_i32, %c8_i32 : i32
    %c1_i32 = arith.constant 1 : i32
    %5:2 = scf.for %arg4 = %c0_i32 to %4 step %c1_i32 iter_args(%arg5 = %2, %arg6 = %3) -> (vector<2x32xf32>, vector<2x32xf32>)  : i32 {
      %c0_4 = arith.constant 0 : index
      %6 = arith.index_cast %arg4 : i32 to index
      %c0_5 = arith.constant 0 : index
      %c0_6 = arith.constant 0 : index
      %7 = vector.load %arg1[%c0_4, %6, %c0_5, %c0_6] : memref<1x8x2x128xf32, #tpu.memory_space<vmem>>, vector<1x1x2x128xf32>
      %8 = vector.shape_cast %7 : vector<1x1x2x128xf32> to vector<2x128xf32>
      %cst_7 = arith.constant dense<0.000000e+00> : vector<2x128xf32>
      %9 = tpu.matmul %arg5, %1, %cst_7 {dimension_numbers = #tpu.dot_dimension_numbers<[1], [0], [0], [1], [0, 0, 1, 1], [], []>} : vector<2x32xf32>, vector<32x128xf32>, vector<2x128xf32> -> vector<2x128xf32>
      %10 = arith.addf %8, %9 : vector<2x128xf32>
      %11 = vector.extract_strided_slice %10 {offsets = [0, 0], sizes = [2, 32], strides = [1, 1]} : vector<2x128xf32> to vector<2x32xf32>
      %12 = arith.negf %11 : vector<2x32xf32>
      %13 = math.exp %12 : vector<2x32xf32>
      %cst_8 = arith.constant 1.000000e+00 : f32
      %14 = vector.broadcast %cst_8 : f32 to vector<2x32xf32>
      %15 = arith.addf %14, %13 : vector<2x32xf32>
      %16 = arith.divf %14, %15 : vector<2x32xf32>
      %17 = vector.extract_strided_slice %10 {offsets = [0, 32], sizes = [2, 32], strides = [1, 1]} : vector<2x128xf32> to vector<2x32xf32>
      %18 = arith.negf %17 : vector<2x32xf32>
      %19 = math.exp %18 : vector<2x32xf32>
      %cst_9 = arith.constant 1.000000e+00 : f32
      %20 = vector.broadcast %cst_9 : f32 to vector<2x32xf32>
      %21 = arith.addf %20, %19 : vector<2x32xf32>
      %22 = arith.divf %20, %21 : vector<2x32xf32>
      %23 = vector.extract_strided_slice %10 {offsets = [0, 64], sizes = [2, 32], strides = [1, 1]} : vector<2x128xf32> to vector<2x32xf32>
      %24 = math.tanh %23 : vector<2x32xf32>
      %25 = vector.extract_strided_slice %10 {offsets = [0, 96], sizes = [2, 32], strides = [1, 1]} : vector<2x128xf32> to vector<2x32xf32>
      %26 = arith.negf %25 : vector<2x32xf32>
      %27 = math.exp %26 : vector<2x32xf32>
      %cst_10 = arith.constant 1.000000e+00 : f32
      %28 = vector.broadcast %cst_10 : f32 to vector<2x32xf32>
      %29 = arith.addf %28, %27 : vector<2x32xf32>
      %30 = arith.divf %28, %29 : vector<2x32xf32>
      %31 = arith.mulf %22, %arg6 : vector<2x32xf32>
      %32 = arith.mulf %16, %24 : vector<2x32xf32>
      %33 = arith.addf %31, %32 : vector<2x32xf32>
      %34 = math.tanh %33 : vector<2x32xf32>
      %35 = arith.mulf %30, %34 : vector<2x32xf32>
      %c0_11 = arith.constant 0 : index
      %36 = arith.index_cast %arg4 : i32 to index
      %c0_12 = arith.constant 0 : index
      %c0_13 = arith.constant 0 : index
      %37 = vector.load %arg3[%c0_11, %36, %c0_12, %c0_13] : memref<1x8x2x32xf32, #tpu.memory_space<vmem>>, vector<1x1x2x32xf32>
      %38 = vector.shape_cast %37 : vector<1x1x2x32xf32> to vector<2x32xf32>
      %39 = vector.shape_cast %35 : vector<2x32xf32> to vector<1x1x2x32xf32>
      tpu.vector_store %arg3[%c0_11, %36, %c0_12, %c0_13], %39 {strides = array<i32>} : memref<1x8x2x32xf32, #tpu.memory_space<vmem>>, vector<1x1x2x32xf32>,
      scf.yield %35, %33 : vector<2x32xf32>, vector<2x32xf32>
    }
    %c8_i32_3 = arith.constant 8 : i32
    return
  }
  func.func @transform_0(%arg0: i32) -> (i32, i32, i32, i32) {
    %c0_i32 = arith.constant 0 : i32
    %c0_i32_0 = arith.constant 0 : i32
    %c0_i32_1 = arith.constant 0 : i32
    %c0_i32_2 = arith.constant 0 : i32
    return %arg0, %c0_i32, %c0_i32_0, %c0_i32_1 : i32, i32, i32, i32
  }
  func.func @transform_1(%arg0: i32) -> (i32, i32, i32) {
    %c0_i32 = arith.constant 0 : i32
    %c0_i32_0 = arith.constant 0 : i32
    %c0_i32_1 = arith.constant 0 : i32
    return %arg0, %c0_i32, %c0_i32_0 : i32, i32, i32
  }
  func.func @transform_2(%arg0: i32) -> (i32, i32, i32, i32) {
    %c0_i32 = arith.constant 0 : i32
    %c0_i32_0 = arith.constant 0 : i32
    %c0_i32_1 = arith.constant 0 : i32
    %c0_i32_2 = arith.constant 0 : i32
    return %arg0, %c0_i32, %c0_i32_0, %c0_i32_1 : i32, i32, i32, i32
  }
}

module attributes {stable_mosaic.version = 11 : i64} {
  func.func @_linear_kernel(%arg0: i32, %arg1: memref<8x64xf32, #tpu.memory_space<vmem>>, %arg2: memref<64x256xf32, #tpu.memory_space<vmem>>, %arg3: memref<1x256xf32, #tpu.memory_space<vmem>>, %arg4: memref<8x256xf32, #tpu.memory_space<vmem>>) attributes {dimension_semantics = [#tpu.dimension_semantics<parallel>], iteration_bounds = array<i64: 1>, scalar_prefetch = 0 : i64, scratch_operands = 0 : i64, tpu.core_type = #tpu.core_type<tc>, window_params = [{transform_indices = @transform_0, window_bounds = array<i64: 8, 64>}, {pipeline_mode = #tpu.pipeline_mode<synchronous>, transform_indices = @transform_1, window_bounds = array<i64: 64, 256>}, {pipeline_mode = #tpu.pipeline_mode<synchronous>, transform_indices = @transform_2, window_bounds = array<i64: 1, 256>}, {transform_indices = @transform_3, window_bounds = array<i64: 8, 256>}]} {
    %c0 = arith.constant 0 : index
    %c0_0 = arith.constant 0 : index
    %0 = vector.load %arg1[%c0, %c0_0] : memref<8x64xf32, #tpu.memory_space<vmem>>, vector<8x64xf32>
    %c0_1 = arith.constant 0 : index
    %c0_2 = arith.constant 0 : index
    %1 = vector.load %arg2[%c0_1, %c0_2] : memref<64x256xf32, #tpu.memory_space<vmem>>, vector<64x256xf32>
    %cst = arith.constant dense<0.000000e+00> : vector<8x256xf32>
    %2 = tpu.matmul %0, %1, %cst {dimension_numbers = #tpu.dot_dimension_numbers<[1], [0], [0], [1], [0, 0, 1, 1], [], []>} : vector<8x64xf32>, vector<64x256xf32>, vector<8x256xf32> -> vector<8x256xf32>
    %c0_3 = arith.constant 0 : index
    %c0_4 = arith.constant 0 : index
    %3 = vector.load %arg3[%c0_3, %c0_4] : memref<1x256xf32, #tpu.memory_space<vmem>>, vector<1x256xf32>
    %4 = vector.broadcast %3 : vector<1x256xf32> to vector<8x256xf32>
    %5 = arith.addf %2, %4 : vector<8x256xf32>
    %c0_5 = arith.constant 0 : index
    %c0_6 = arith.constant 0 : index
    %6 = vector.load %arg4[%c0_5, %c0_6] : memref<8x256xf32, #tpu.memory_space<vmem>>, vector<8x256xf32>
    tpu.vector_store %arg4[%c0_5, %c0_6], %5 {strides = array<i32>} : memref<8x256xf32, #tpu.memory_space<vmem>>, vector<8x256xf32>,
    return
  }
  func.func @transform_0(%arg0: i32) -> (i32, i32) {
    %c0_i32 = arith.constant 0 : i32
    %c0_i32_0 = arith.constant 0 : i32
    return %arg0, %c0_i32 : i32, i32
  }
  func.func @transform_1(%arg0: i32) -> (i32, i32) {
    %c0_i32 = arith.constant 0 : i32
    %c0_i32_0 = arith.constant 0 : i32
    %c0_i32_1 = arith.constant 0 : i32
    return %c0_i32, %c0_i32_0 : i32, i32
  }
  func.func @transform_2(%arg0: i32) -> (i32, i32) {
    %c0_i32 = arith.constant 0 : i32
    %c0_i32_0 = arith.constant 0 : i32
    %c0_i32_1 = arith.constant 0 : i32
    return %c0_i32, %c0_i32_0 : i32, i32
  }
  func.func @transform_3(%arg0: i32) -> (i32, i32) {
    %c0_i32 = arith.constant 0 : i32
    %c0_i32_0 = arith.constant 0 : i32
    return %arg0, %c0_i32 : i32, i32
  }
}

module attributes {stable_mosaic.version = 11 : i64} {
  func.func @_lstm_dir_kernel(%arg0: i32, %arg1: memref<1x4x2x128xf32, #tpu.memory_space<vmem>>, %arg2: memref<1x32x128xf32, #tpu.memory_space<vmem>>, %arg3: memref<1x4x2x32xf32, #tpu.memory_space<vmem>>) attributes {dimension_semantics = [#tpu.dimension_semantics<parallel>], iteration_bounds = array<i64: 2>, scalar_prefetch = 0 : i64, scratch_operands = 0 : i64, tpu.core_type = #tpu.core_type<tc>, window_params = [{transform_indices = @transform_0, window_bounds = array<i64: 1, 4, 2, 128>}, {transform_indices = @transform_1, window_bounds = array<i64: 1, 32, 128>}, {transform_indices = @transform_2, window_bounds = array<i64: 1, 4, 2, 32>}]} {
    %c0 = arith.constant 0 : index
    %c0_0 = arith.constant 0 : index
    %c0_1 = arith.constant 0 : index
    %0 = vector.load %arg2[%c0, %c0_0, %c0_1] : memref<1x32x128xf32, #tpu.memory_space<vmem>>, vector<1x32x128xf32>
    %1 = vector.shape_cast %0 : vector<1x32x128xf32> to vector<32x128xf32>
    %cst = arith.constant 0.000000e+00 : f32
    %2 = vector.broadcast %cst : f32 to vector<2x32xf32>
    %cst_2 = arith.constant 0.000000e+00 : f32
    %3 = vector.broadcast %cst_2 : f32 to vector<2x32xf32>
    %c0_i32 = arith.constant 0 : i32
    %c4_i32 = arith.constant 4 : i32
    %4 = arith.addi %c0_i32, %c4_i32 : i32
    %c1_i32 = arith.constant 1 : i32
    %5:2 = scf.for %arg4 = %c0_i32 to %4 step %c1_i32 iter_args(%arg5 = %2, %arg6 = %3) -> (vector<2x32xf32>, vector<2x32xf32>)  : i32 {
      %c0_4 = arith.constant 0 : index
      %6 = arith.index_cast %arg4 : i32 to index
      %c0_5 = arith.constant 0 : index
      %c0_6 = arith.constant 0 : index
      %7 = vector.load %arg1[%c0_4, %6, %c0_5, %c0_6] : memref<1x4x2x128xf32, #tpu.memory_space<vmem>>, vector<1x1x2x128xf32>
      %8 = vector.shape_cast %7 : vector<1x1x2x128xf32> to vector<2x128xf32>
      %cst_7 = arith.constant dense<0.000000e+00> : vector<2x128xf32>
      %9 = tpu.matmul %arg5, %1, %cst_7 {dimension_numbers = #tpu.dot_dimension_numbers<[1], [0], [0], [1], [0, 0, 1, 1], [], []>} : vector<2x32xf32>, vector<32x128xf32>, vector<2x128xf32> -> vector<2x128xf32>
      %10 = arith.addf %8, %9 : vector<2x128xf32>
      %11 = vector.extract_strided_slice %10 {offsets = [0, 0], sizes = [2, 32], strides = [1, 1]} : vector<2x128xf32> to vector<2x32xf32>
      %12 = arith.negf %11 : vector<2x32xf32>
      %13 = math.exp %12 : vector<2x32xf32>
      %cst_8 = arith.constant 1.000000e+00 : f32
      %14 = vector.broadcast %cst_8 : f32 to vector<2x32xf32>
      %15 = arith.addf %14, %13 : vector<2x32xf32>
      %16 = arith.divf %14, %15 : vector<2x32xf32>
      %17 = vector.extract_strided_slice %10 {offsets = [0, 32], sizes = [2, 32], strides = [1, 1]} : vector<2x128xf32> to vector<2x32xf32>
      %18 = arith.negf %17 : vector<2x32xf32>
      %19 = math.exp %18 : vector<2x32xf32>
      %cst_9 = arith.constant 1.000000e+00 : f32
      %20 = vector.broadcast %cst_9 : f32 to vector<2x32xf32>
      %21 = arith.addf %20, %19 : vector<2x32xf32>
      %22 = arith.divf %20, %21 : vector<2x32xf32>
      %23 = vector.extract_strided_slice %10 {offsets = [0, 64], sizes = [2, 32], strides = [1, 1]} : vector<2x128xf32> to vector<2x32xf32>
      %24 = math.tanh %23 : vector<2x32xf32>
      %25 = vector.extract_strided_slice %10 {offsets = [0, 96], sizes = [2, 32], strides = [1, 1]} : vector<2x128xf32> to vector<2x32xf32>
      %26 = arith.negf %25 : vector<2x32xf32>
      %27 = math.exp %26 : vector<2x32xf32>
      %cst_10 = arith.constant 1.000000e+00 : f32
      %28 = vector.broadcast %cst_10 : f32 to vector<2x32xf32>
      %29 = arith.addf %28, %27 : vector<2x32xf32>
      %30 = arith.divf %28, %29 : vector<2x32xf32>
      %31 = arith.mulf %22, %arg6 : vector<2x32xf32>
      %32 = arith.mulf %16, %24 : vector<2x32xf32>
      %33 = arith.addf %31, %32 : vector<2x32xf32>
      %34 = math.tanh %33 : vector<2x32xf32>
      %35 = arith.mulf %30, %34 : vector<2x32xf32>
      %c0_11 = arith.constant 0 : index
      %36 = arith.index_cast %arg4 : i32 to index
      %c0_12 = arith.constant 0 : index
      %c0_13 = arith.constant 0 : index
      %37 = vector.load %arg3[%c0_11, %36, %c0_12, %c0_13] : memref<1x4x2x32xf32, #tpu.memory_space<vmem>>, vector<1x1x2x32xf32>
      %38 = vector.shape_cast %37 : vector<1x1x2x32xf32> to vector<2x32xf32>
      %39 = vector.shape_cast %35 : vector<2x32xf32> to vector<1x1x2x32xf32>
      tpu.vector_store %arg3[%c0_11, %36, %c0_12, %c0_13], %39 {strides = array<i32>} : memref<1x4x2x32xf32, #tpu.memory_space<vmem>>, vector<1x1x2x32xf32>,
      scf.yield %35, %33 : vector<2x32xf32>, vector<2x32xf32>
    }
    %c4_i32_3 = arith.constant 4 : i32
    return
  }
  func.func @transform_0(%arg0: i32) -> (i32, i32, i32, i32) {
    %c0_i32 = arith.constant 0 : i32
    %c0_i32_0 = arith.constant 0 : i32
    %c0_i32_1 = arith.constant 0 : i32
    %c0_i32_2 = arith.constant 0 : i32
    return %arg0, %c0_i32, %c0_i32_0, %c0_i32_1 : i32, i32, i32, i32
  }
  func.func @transform_1(%arg0: i32) -> (i32, i32, i32) {
    %c0_i32 = arith.constant 0 : i32
    %c0_i32_0 = arith.constant 0 : i32
    %c0_i32_1 = arith.constant 0 : i32
    return %arg0, %c0_i32, %c0_i32_0 : i32, i32, i32
  }
  func.func @transform_2(%arg0: i32) -> (i32, i32, i32, i32) {
    %c0_i32 = arith.constant 0 : i32
    %c0_i32_0 = arith.constant 0 : i32
    %c0_i32_1 = arith.constant 0 : i32
    %c0_i32_2 = arith.constant 0 : i32
    return %arg0, %c0_i32, %c0_i32_0, %c0_i32_1 : i32, i32, i32, i32
  }
}

module attributes {stable_mosaic.version = 11 : i64} {
  func.func @_linear_kernel(%arg0: i32, %arg1: memref<4x64xf32, #tpu.memory_space<vmem>>, %arg2: memref<64x256xf32, #tpu.memory_space<vmem>>, %arg3: memref<1x256xf32, #tpu.memory_space<vmem>>, %arg4: memref<4x256xf32, #tpu.memory_space<vmem>>) attributes {dimension_semantics = [#tpu.dimension_semantics<parallel>], iteration_bounds = array<i64: 1>, scalar_prefetch = 0 : i64, scratch_operands = 0 : i64, tpu.core_type = #tpu.core_type<tc>, window_params = [{transform_indices = @transform_0, window_bounds = array<i64: 4, 64>}, {pipeline_mode = #tpu.pipeline_mode<synchronous>, transform_indices = @transform_1, window_bounds = array<i64: 64, 256>}, {pipeline_mode = #tpu.pipeline_mode<synchronous>, transform_indices = @transform_2, window_bounds = array<i64: 1, 256>}, {transform_indices = @transform_3, window_bounds = array<i64: 4, 256>}]} {
    %c0 = arith.constant 0 : index
    %c0_0 = arith.constant 0 : index
    %0 = vector.load %arg1[%c0, %c0_0] : memref<4x64xf32, #tpu.memory_space<vmem>>, vector<4x64xf32>
    %c0_1 = arith.constant 0 : index
    %c0_2 = arith.constant 0 : index
    %1 = vector.load %arg2[%c0_1, %c0_2] : memref<64x256xf32, #tpu.memory_space<vmem>>, vector<64x256xf32>
    %cst = arith.constant dense<0.000000e+00> : vector<4x256xf32>
    %2 = tpu.matmul %0, %1, %cst {dimension_numbers = #tpu.dot_dimension_numbers<[1], [0], [0], [1], [0, 0, 1, 1], [], []>} : vector<4x64xf32>, vector<64x256xf32>, vector<4x256xf32> -> vector<4x256xf32>
    %c0_3 = arith.constant 0 : index
    %c0_4 = arith.constant 0 : index
    %3 = vector.load %arg3[%c0_3, %c0_4] : memref<1x256xf32, #tpu.memory_space<vmem>>, vector<1x256xf32>
    %4 = vector.broadcast %3 : vector<1x256xf32> to vector<4x256xf32>
    %5 = arith.addf %2, %4 : vector<4x256xf32>
    %c0_5 = arith.constant 0 : index
    %c0_6 = arith.constant 0 : index
    %6 = vector.load %arg4[%c0_5, %c0_6] : memref<4x256xf32, #tpu.memory_space<vmem>>, vector<4x256xf32>
    tpu.vector_store %arg4[%c0_5, %c0_6], %5 {strides = array<i32>} : memref<4x256xf32, #tpu.memory_space<vmem>>, vector<4x256xf32>,
    return
  }
  func.func @transform_0(%arg0: i32) -> (i32, i32) {
    %c0_i32 = arith.constant 0 : i32
    %c0_i32_0 = arith.constant 0 : i32
    return %arg0, %c0_i32 : i32, i32
  }
  func.func @transform_1(%arg0: i32) -> (i32, i32) {
    %c0_i32 = arith.constant 0 : i32
    %c0_i32_0 = arith.constant 0 : i32
    %c0_i32_1 = arith.constant 0 : i32
    return %c0_i32, %c0_i32_0 : i32, i32
  }
  func.func @transform_2(%arg0: i32) -> (i32, i32) {
    %c0_i32 = arith.constant 0 : i32
    %c0_i32_0 = arith.constant 0 : i32
    %c0_i32_1 = arith.constant 0 : i32
    return %c0_i32, %c0_i32_0 : i32, i32
  }
  func.func @transform_3(%arg0: i32) -> (i32, i32) {
    %c0_i32 = arith.constant 0 : i32
    %c0_i32_0 = arith.constant 0 : i32
    return %arg0, %c0_i32 : i32, i32
  }
}

module attributes {stable_mosaic.version = 11 : i64} {
  func.func @_lstm_dir_kernel(%arg0: i32, %arg1: memref<1x2x2x128xf32, #tpu.memory_space<vmem>>, %arg2: memref<1x32x128xf32, #tpu.memory_space<vmem>>, %arg3: memref<1x2x2x32xf32, #tpu.memory_space<vmem>>) attributes {dimension_semantics = [#tpu.dimension_semantics<parallel>], iteration_bounds = array<i64: 2>, scalar_prefetch = 0 : i64, scratch_operands = 0 : i64, tpu.core_type = #tpu.core_type<tc>, window_params = [{transform_indices = @transform_0, window_bounds = array<i64: 1, 2, 2, 128>}, {transform_indices = @transform_1, window_bounds = array<i64: 1, 32, 128>}, {transform_indices = @transform_2, window_bounds = array<i64: 1, 2, 2, 32>}]} {
    %c0 = arith.constant 0 : index
    %c0_0 = arith.constant 0 : index
    %c0_1 = arith.constant 0 : index
    %0 = vector.load %arg2[%c0, %c0_0, %c0_1] : memref<1x32x128xf32, #tpu.memory_space<vmem>>, vector<1x32x128xf32>
    %1 = vector.shape_cast %0 : vector<1x32x128xf32> to vector<32x128xf32>
    %cst = arith.constant 0.000000e+00 : f32
    %2 = vector.broadcast %cst : f32 to vector<2x32xf32>
    %cst_2 = arith.constant 0.000000e+00 : f32
    %3 = vector.broadcast %cst_2 : f32 to vector<2x32xf32>
    %c0_i32 = arith.constant 0 : i32
    %c2_i32 = arith.constant 2 : i32
    %4 = arith.addi %c0_i32, %c2_i32 : i32
    %c1_i32 = arith.constant 1 : i32
    %5:2 = scf.for %arg4 = %c0_i32 to %4 step %c1_i32 iter_args(%arg5 = %2, %arg6 = %3) -> (vector<2x32xf32>, vector<2x32xf32>)  : i32 {
      %c0_4 = arith.constant 0 : index
      %6 = arith.index_cast %arg4 : i32 to index
      %c0_5 = arith.constant 0 : index
      %c0_6 = arith.constant 0 : index
      %7 = vector.load %arg1[%c0_4, %6, %c0_5, %c0_6] : memref<1x2x2x128xf32, #tpu.memory_space<vmem>>, vector<1x1x2x128xf32>
      %8 = vector.shape_cast %7 : vector<1x1x2x128xf32> to vector<2x128xf32>
      %cst_7 = arith.constant dense<0.000000e+00> : vector<2x128xf32>
      %9 = tpu.matmul %arg5, %1, %cst_7 {dimension_numbers = #tpu.dot_dimension_numbers<[1], [0], [0], [1], [0, 0, 1, 1], [], []>} : vector<2x32xf32>, vector<32x128xf32>, vector<2x128xf32> -> vector<2x128xf32>
      %10 = arith.addf %8, %9 : vector<2x128xf32>
      %11 = vector.extract_strided_slice %10 {offsets = [0, 0], sizes = [2, 32], strides = [1, 1]} : vector<2x128xf32> to vector<2x32xf32>
      %12 = arith.negf %11 : vector<2x32xf32>
      %13 = math.exp %12 : vector<2x32xf32>
      %cst_8 = arith.constant 1.000000e+00 : f32
      %14 = vector.broadcast %cst_8 : f32 to vector<2x32xf32>
      %15 = arith.addf %14, %13 : vector<2x32xf32>
      %16 = arith.divf %14, %15 : vector<2x32xf32>
      %17 = vector.extract_strided_slice %10 {offsets = [0, 32], sizes = [2, 32], strides = [1, 1]} : vector<2x128xf32> to vector<2x32xf32>
      %18 = arith.negf %17 : vector<2x32xf32>
      %19 = math.exp %18 : vector<2x32xf32>
      %cst_9 = arith.constant 1.000000e+00 : f32
      %20 = vector.broadcast %cst_9 : f32 to vector<2x32xf32>
      %21 = arith.addf %20, %19 : vector<2x32xf32>
      %22 = arith.divf %20, %21 : vector<2x32xf32>
      %23 = vector.extract_strided_slice %10 {offsets = [0, 64], sizes = [2, 32], strides = [1, 1]} : vector<2x128xf32> to vector<2x32xf32>
      %24 = math.tanh %23 : vector<2x32xf32>
      %25 = vector.extract_strided_slice %10 {offsets = [0, 96], sizes = [2, 32], strides = [1, 1]} : vector<2x128xf32> to vector<2x32xf32>
      %26 = arith.negf %25 : vector<2x32xf32>
      %27 = math.exp %26 : vector<2x32xf32>
      %cst_10 = arith.constant 1.000000e+00 : f32
      %28 = vector.broadcast %cst_10 : f32 to vector<2x32xf32>
      %29 = arith.addf %28, %27 : vector<2x32xf32>
      %30 = arith.divf %28, %29 : vector<2x32xf32>
      %31 = arith.mulf %22, %arg6 : vector<2x32xf32>
      %32 = arith.mulf %16, %24 : vector<2x32xf32>
      %33 = arith.addf %31, %32 : vector<2x32xf32>
      %34 = math.tanh %33 : vector<2x32xf32>
      %35 = arith.mulf %30, %34 : vector<2x32xf32>
      %c0_11 = arith.constant 0 : index
      %36 = arith.index_cast %arg4 : i32 to index
      %c0_12 = arith.constant 0 : index
      %c0_13 = arith.constant 0 : index
      %37 = vector.load %arg3[%c0_11, %36, %c0_12, %c0_13] : memref<1x2x2x32xf32, #tpu.memory_space<vmem>>, vector<1x1x2x32xf32>
      %38 = vector.shape_cast %37 : vector<1x1x2x32xf32> to vector<2x32xf32>
      %39 = vector.shape_cast %35 : vector<2x32xf32> to vector<1x1x2x32xf32>
      tpu.vector_store %arg3[%c0_11, %36, %c0_12, %c0_13], %39 {strides = array<i32>} : memref<1x2x2x32xf32, #tpu.memory_space<vmem>>, vector<1x1x2x32xf32>,
      scf.yield %35, %33 : vector<2x32xf32>, vector<2x32xf32>
    }
    %c2_i32_3 = arith.constant 2 : i32
    return
  }
  func.func @transform_0(%arg0: i32) -> (i32, i32, i32, i32) {
    %c0_i32 = arith.constant 0 : i32
    %c0_i32_0 = arith.constant 0 : i32
    %c0_i32_1 = arith.constant 0 : i32
    %c0_i32_2 = arith.constant 0 : i32
    return %arg0, %c0_i32, %c0_i32_0, %c0_i32_1 : i32, i32, i32, i32
  }
  func.func @transform_1(%arg0: i32) -> (i32, i32, i32) {
    %c0_i32 = arith.constant 0 : i32
    %c0_i32_0 = arith.constant 0 : i32
    %c0_i32_1 = arith.constant 0 : i32
    return %arg0, %c0_i32, %c0_i32_0 : i32, i32, i32
  }
  func.func @transform_2(%arg0: i32) -> (i32, i32, i32, i32) {
    %c0_i32 = arith.constant 0 : i32
    %c0_i32_0 = arith.constant 0 : i32
    %c0_i32_1 = arith.constant 0 : i32
    %c0_i32_2 = arith.constant 0 : i32
    return %arg0, %c0_i32, %c0_i32_0, %c0_i32_1 : i32, i32, i32, i32
  }
}

module attributes {stable_mosaic.version = 11 : i64} {
  func.func @_listener_proj_kernel(%arg0: i32, %arg1: memref<4x64xf32, #tpu.memory_space<vmem>>, %arg2: memref<64x32xf32, #tpu.memory_space<vmem>>, %arg3: memref<1x32xf32, #tpu.memory_space<vmem>>, %arg4: memref<32x64xf32, #tpu.memory_space<vmem>>, %arg5: memref<1x64xf32, #tpu.memory_space<vmem>>, %arg6: memref<4x64xf32, #tpu.memory_space<vmem>>) attributes {dimension_semantics = [#tpu.dimension_semantics<parallel>], iteration_bounds = array<i64: 1>, scalar_prefetch = 0 : i64, scratch_operands = 0 : i64, tpu.core_type = #tpu.core_type<tc>, window_params = [{transform_indices = @transform_0, window_bounds = array<i64: 4, 64>}, {pipeline_mode = #tpu.pipeline_mode<synchronous>, transform_indices = @transform_1, window_bounds = array<i64: 64, 32>}, {pipeline_mode = #tpu.pipeline_mode<synchronous>, transform_indices = @transform_2, window_bounds = array<i64: 1, 32>}, {pipeline_mode = #tpu.pipeline_mode<synchronous>, transform_indices = @transform_3, window_bounds = array<i64: 32, 64>}, {pipeline_mode = #tpu.pipeline_mode<synchronous>, transform_indices = @transform_4, window_bounds = array<i64: 1, 64>}, {transform_indices = @transform_5, window_bounds = array<i64: 4, 64>}]} {
    %c0 = arith.constant 0 : index
    %c0_0 = arith.constant 0 : index
    %0 = vector.load %arg1[%c0, %c0_0] : memref<4x64xf32, #tpu.memory_space<vmem>>, vector<4x64xf32>
    %c0_1 = arith.constant 0 : index
    %c0_2 = arith.constant 0 : index
    %1 = vector.load %arg2[%c0_1, %c0_2] : memref<64x32xf32, #tpu.memory_space<vmem>>, vector<64x32xf32>
    %cst = arith.constant dense<0.000000e+00> : vector<4x32xf32>
    %2 = tpu.matmul %0, %1, %cst {dimension_numbers = #tpu.dot_dimension_numbers<[1], [0], [0], [1], [0, 0, 1, 1], [], []>} : vector<4x64xf32>, vector<64x32xf32>, vector<4x32xf32> -> vector<4x32xf32>
    %c0_3 = arith.constant 0 : index
    %c0_4 = arith.constant 0 : index
    %3 = vector.load %arg3[%c0_3, %c0_4] : memref<1x32xf32, #tpu.memory_space<vmem>>, vector<1x32xf32>
    %4 = vector.broadcast %3 : vector<1x32xf32> to vector<4x32xf32>
    %5 = arith.addf %2, %4 : vector<4x32xf32>
    %c0_5 = arith.constant 0 : index
    %c0_6 = arith.constant 0 : index
    %6 = vector.load %arg4[%c0_5, %c0_6] : memref<32x64xf32, #tpu.memory_space<vmem>>, vector<32x64xf32>
    %cst_7 = arith.constant dense<0.000000e+00> : vector<4x64xf32>
    %7 = tpu.matmul %5, %6, %cst_7 {dimension_numbers = #tpu.dot_dimension_numbers<[1], [0], [0], [1], [0, 0, 1, 1], [], []>} : vector<4x32xf32>, vector<32x64xf32>, vector<4x64xf32> -> vector<4x64xf32>
    %c0_8 = arith.constant 0 : index
    %c0_9 = arith.constant 0 : index
    %8 = vector.load %arg5[%c0_8, %c0_9] : memref<1x64xf32, #tpu.memory_space<vmem>>, vector<1x64xf32>
    %9 = vector.broadcast %8 : vector<1x64xf32> to vector<4x64xf32>
    %10 = arith.addf %7, %9 : vector<4x64xf32>
    %c0_10 = arith.constant 0 : index
    %c0_11 = arith.constant 0 : index
    %11 = vector.load %arg6[%c0_10, %c0_11] : memref<4x64xf32, #tpu.memory_space<vmem>>, vector<4x64xf32>
    tpu.vector_store %arg6[%c0_10, %c0_11], %10 {strides = array<i32>} : memref<4x64xf32, #tpu.memory_space<vmem>>, vector<4x64xf32>,
    return
  }
  func.func @transform_0(%arg0: i32) -> (i32, i32) {
    %c0_i32 = arith.constant 0 : i32
    %c0_i32_0 = arith.constant 0 : i32
    return %arg0, %c0_i32 : i32, i32
  }
  func.func @transform_1(%arg0: i32) -> (i32, i32) {
    %c0_i32 = arith.constant 0 : i32
    %c0_i32_0 = arith.constant 0 : i32
    %c0_i32_1 = arith.constant 0 : i32
    return %c0_i32, %c0_i32_0 : i32, i32
  }
  func.func @transform_2(%arg0: i32) -> (i32, i32) {
    %c0_i32 = arith.constant 0 : i32
    %c0_i32_0 = arith.constant 0 : i32
    %c0_i32_1 = arith.constant 0 : i32
    return %c0_i32, %c0_i32_0 : i32, i32
  }
  func.func @transform_3(%arg0: i32) -> (i32, i32) {
    %c0_i32 = arith.constant 0 : i32
    %c0_i32_0 = arith.constant 0 : i32
    %c0_i32_1 = arith.constant 0 : i32
    return %c0_i32, %c0_i32_0 : i32, i32
  }
  func.func @transform_4(%arg0: i32) -> (i32, i32) {
    %c0_i32 = arith.constant 0 : i32
    %c0_i32_0 = arith.constant 0 : i32
    %c0_i32_1 = arith.constant 0 : i32
    return %c0_i32, %c0_i32_0 : i32, i32
  }
  func.func @transform_5(%arg0: i32) -> (i32, i32) {
    %c0_i32 = arith.constant 0 : i32
    %c0_i32_0 = arith.constant 0 : i32
    return %arg0, %c0_i32 : i32, i32
  }
}

module attributes {stable_mosaic.version = 11 : i64} {
  func.func @_linear_kernel(%arg0: i32, %arg1: memref<16x16xf32, #tpu.memory_space<vmem>>, %arg2: memref<16x128xf32, #tpu.memory_space<vmem>>, %arg3: memref<1x128xf32, #tpu.memory_space<vmem>>, %arg4: memref<16x128xf32, #tpu.memory_space<vmem>>) attributes {dimension_semantics = [#tpu.dimension_semantics<parallel>], iteration_bounds = array<i64: 1>, scalar_prefetch = 0 : i64, scratch_operands = 0 : i64, tpu.core_type = #tpu.core_type<tc>, window_params = [{transform_indices = @transform_0, window_bounds = array<i64: 16, 16>}, {pipeline_mode = #tpu.pipeline_mode<synchronous>, transform_indices = @transform_1, window_bounds = array<i64: 16, 128>}, {pipeline_mode = #tpu.pipeline_mode<synchronous>, transform_indices = @transform_2, window_bounds = array<i64: 1, 128>}, {transform_indices = @transform_3, window_bounds = array<i64: 16, 128>}]} {
    %c0 = arith.constant 0 : index
    %c0_0 = arith.constant 0 : index
    %0 = vector.load %arg1[%c0, %c0_0] : memref<16x16xf32, #tpu.memory_space<vmem>>, vector<16x16xf32>
    %c0_1 = arith.constant 0 : index
    %c0_2 = arith.constant 0 : index
    %1 = vector.load %arg2[%c0_1, %c0_2] : memref<16x128xf32, #tpu.memory_space<vmem>>, vector<16x128xf32>
    %cst = arith.constant dense<0.000000e+00> : vector<16x128xf32>
    %2 = tpu.matmul %0, %1, %cst {dimension_numbers = #tpu.dot_dimension_numbers<[1], [0], [0], [1], [0, 0, 1, 1], [], []>} : vector<16x16xf32>, vector<16x128xf32>, vector<16x128xf32> -> vector<16x128xf32>
    %c0_3 = arith.constant 0 : index
    %c0_4 = arith.constant 0 : index
    %3 = vector.load %arg3[%c0_3, %c0_4] : memref<1x128xf32, #tpu.memory_space<vmem>>, vector<1x128xf32>
    %4 = vector.broadcast %3 : vector<1x128xf32> to vector<16x128xf32>
    %5 = arith.addf %2, %4 : vector<16x128xf32>
    %c0_5 = arith.constant 0 : index
    %c0_6 = arith.constant 0 : index
    %6 = vector.load %arg4[%c0_5, %c0_6] : memref<16x128xf32, #tpu.memory_space<vmem>>, vector<16x128xf32>
    tpu.vector_store %arg4[%c0_5, %c0_6], %5 {strides = array<i32>} : memref<16x128xf32, #tpu.memory_space<vmem>>, vector<16x128xf32>,
    return
  }
  func.func @transform_0(%arg0: i32) -> (i32, i32) {
    %c0_i32 = arith.constant 0 : i32
    %c0_i32_0 = arith.constant 0 : i32
    return %arg0, %c0_i32 : i32, i32
  }
  func.func @transform_1(%arg0: i32) -> (i32, i32) {
    %c0_i32 = arith.constant 0 : i32
    %c0_i32_0 = arith.constant 0 : i32
    %c0_i32_1 = arith.constant 0 : i32
    return %c0_i32, %c0_i32_0 : i32, i32
  }
  func.func @transform_2(%arg0: i32) -> (i32, i32) {
    %c0_i32 = arith.constant 0 : i32
    %c0_i32_0 = arith.constant 0 : i32
    %c0_i32_1 = arith.constant 0 : i32
    return %c0_i32, %c0_i32_0 : i32, i32
  }
  func.func @transform_3(%arg0: i32) -> (i32, i32) {
    %c0_i32 = arith.constant 0 : i32
    %c0_i32_0 = arith.constant 0 : i32
    return %arg0, %c0_i32 : i32, i32
  }
}

module attributes {stable_mosaic.version = 11 : i64} {
  func.func @_decoder_kernel(%arg0: memref<8x2x128xf32, #tpu.memory_space<vmem>>, %arg1: memref<2x2x32xf32, #tpu.memory_space<vmem>>, %arg2: memref<2x2x32xf32, #tpu.memory_space<vmem>>, %arg3: memref<2x1xi32, #tpu.memory_space<vmem>>, %arg4: memref<64x128xf32, #tpu.memory_space<vmem>>, %arg5: memref<64x128xf32, #tpu.memory_space<vmem>>, %arg6: memref<1x128xf32, #tpu.memory_space<vmem>>, %arg7: memref<64x30xf32, #tpu.memory_space<vmem>>, %arg8: memref<1x30xf32, #tpu.memory_space<vmem>>, %arg9: memref<8x2x30xf32, #tpu.memory_space<vmem>>) attributes {dimension_semantics = [], scalar_prefetch = 0 : i64, scratch_operands = 0 : i64, tpu.core_type = #tpu.core_type<tc>} {
    %c0 = arith.constant 0 : index
    %c0_0 = arith.constant 0 : index
    %c0_1 = arith.constant 0 : index
    %0 = vector.load %arg1[%c0, %c0_0, %c0_1] : memref<2x2x32xf32, #tpu.memory_space<vmem>>, vector<2x2x32xf32>
    %c0_2 = arith.constant 0 : index
    %c0_3 = arith.constant 0 : index
    %c0_4 = arith.constant 0 : index
    %1 = vector.load %arg2[%c0_2, %c0_3, %c0_4] : memref<2x2x32xf32, #tpu.memory_space<vmem>>, vector<2x2x32xf32>
    %c0_5 = arith.constant 0 : index
    %c0_6 = arith.constant 0 : index
    %2 = vector.load %arg4[%c0_5, %c0_6] : memref<64x128xf32, #tpu.memory_space<vmem>>, vector<64x128xf32>
    %c0_7 = arith.constant 0 : index
    %c0_8 = arith.constant 0 : index
    %3 = vector.load %arg5[%c0_7, %c0_8] : memref<64x128xf32, #tpu.memory_space<vmem>>, vector<64x128xf32>
    %c0_9 = arith.constant 0 : index
    %c0_10 = arith.constant 0 : index
    %4 = vector.load %arg6[%c0_9, %c0_10] : memref<1x128xf32, #tpu.memory_space<vmem>>, vector<1x128xf32>
    %c0_11 = arith.constant 0 : index
    %c0_12 = arith.constant 0 : index
    %5 = vector.load %arg7[%c0_11, %c0_12] : memref<64x30xf32, #tpu.memory_space<vmem>>, vector<64x30xf32>
    %c0_13 = arith.constant 0 : index
    %c0_14 = arith.constant 0 : index
    %6 = vector.load %arg8[%c0_13, %c0_14] : memref<1x30xf32, #tpu.memory_space<vmem>>, vector<1x30xf32>
    %7 = tpu.iota {dimensions = array<i32: 1>} : vector<2x2xi32>
    %c0_15 = arith.constant 0 : index
    %c0_16 = arith.constant 0 : index
    %8 = vector.load %arg3[%c0_15, %c0_16] : memref<2x1xi32, #tpu.memory_space<vmem>>, vector<2x1xi32>
    %9 = vector.broadcast %8 : vector<2x1xi32> to vector<2x2xi32>
    %10 = arith.cmpi sge, %7, %9 : vector<2x2xi32>
    %cst = arith.constant 0.000000e+00 : f32
    %11 = vector.broadcast %cst : f32 to vector<2x32xf32>
    %12 = vector.extract_strided_slice %0 {offsets = [0, 0, 0], sizes = [2, 1, 32], strides = [1, 1, 1]} : vector<2x2x32xf32> to vector<2x1x32xf32>
    %13 = vector.shape_cast %12 : vector<2x1x32xf32> to vector<2x32xf32>
    %cst_17 = arith.constant 0.000000e+00 : f32
    %14 = vector.broadcast %cst_17 : f32 to vector<2x32xf32>
    %cst_18 = arith.constant 0.000000e+00 : f32
    %15 = vector.broadcast %cst_18 : f32 to vector<2x32xf32>
    %cst_19 = arith.constant 0.000000e+00 : f32
    %16 = vector.broadcast %cst_19 : f32 to vector<2x32xf32>
    %c0_i32 = arith.constant 0 : i32
    %c8_i32 = arith.constant 8 : i32
    %17 = arith.addi %c0_i32, %c8_i32 : i32
    %c1_i32 = arith.constant 1 : i32
    %18:5 = scf.for %arg10 = %c0_i32 to %17 step %c1_i32 iter_args(%arg11 = %11, %arg12 = %14, %arg13 = %15, %arg14 = %16, %arg15 = %13) -> (vector<2x32xf32>, vector<2x32xf32>, vector<2x32xf32>, vector<2x32xf32>, vector<2x32xf32>)  : i32 {
      %19 = arith.index_cast %arg10 : i32 to index
      %c0_21 = arith.constant 0 : index
      %c0_22 = arith.constant 0 : index
      %20 = vector.load %arg0[%19, %c0_21, %c0_22] : memref<8x2x128xf32, #tpu.memory_space<vmem>>, vector<1x2x128xf32>
      %21 = vector.shape_cast %20 : vector<1x2x128xf32> to vector<2x128xf32>
      %22 = tpu.concatenate %arg15, %arg11 in 1 : vector<2x32xf32>, vector<2x32xf32> -> vector<2x64xf32>
      %cst_23 = arith.constant dense<0.000000e+00> : vector<2x128xf32>
      %23 = tpu.matmul %22, %2, %cst_23 {dimension_numbers = #tpu.dot_dimension_numbers<[1], [0], [0], [1], [0, 0, 1, 1], [], []>} : vector<2x64xf32>, vector<64x128xf32>, vector<2x128xf32> -> vector<2x128xf32>
      %24 = arith.addf %21, %23 : vector<2x128xf32>
      %25 = vector.extract_strided_slice %24 {offsets = [0, 0], sizes = [2, 32], strides = [1, 1]} : vector<2x128xf32> to vector<2x32xf32>
      %26 = arith.negf %25 : vector<2x32xf32>
      %27 = math.exp %26 : vector<2x32xf32>
      %cst_24 = arith.constant 1.000000e+00 : f32
      %28 = vector.broadcast %cst_24 : f32 to vector<2x32xf32>
      %29 = arith.addf %28, %27 : vector<2x32xf32>
      %30 = arith.divf %28, %29 : vector<2x32xf32>
      %31 = vector.extract_strided_slice %24 {offsets = [0, 32], sizes = [2, 32], strides = [1, 1]} : vector<2x128xf32> to vector<2x32xf32>
      %32 = arith.negf %31 : vector<2x32xf32>
      %33 = math.exp %32 : vector<2x32xf32>
      %cst_25 = arith.constant 1.000000e+00 : f32
      %34 = vector.broadcast %cst_25 : f32 to vector<2x32xf32>
      %35 = arith.addf %34, %33 : vector<2x32xf32>
      %36 = arith.divf %34, %35 : vector<2x32xf32>
      %37 = vector.extract_strided_slice %24 {offsets = [0, 64], sizes = [2, 32], strides = [1, 1]} : vector<2x128xf32> to vector<2x32xf32>
      %38 = math.tanh %37 : vector<2x32xf32>
      %39 = vector.extract_strided_slice %24 {offsets = [0, 96], sizes = [2, 32], strides = [1, 1]} : vector<2x128xf32> to vector<2x32xf32>
      %40 = arith.negf %39 : vector<2x32xf32>
      %41 = math.exp %40 : vector<2x32xf32>
      %cst_26 = arith.constant 1.000000e+00 : f32
      %42 = vector.broadcast %cst_26 : f32 to vector<2x32xf32>
      %43 = arith.addf %42, %41 : vector<2x32xf32>
      %44 = arith.divf %42, %43 : vector<2x32xf32>
      %45 = arith.mulf %36, %arg12 : vector<2x32xf32>
      %46 = arith.mulf %30, %38 : vector<2x32xf32>
      %47 = arith.addf %45, %46 : vector<2x32xf32>
      %48 = math.tanh %47 : vector<2x32xf32>
      %49 = arith.mulf %44, %48 : vector<2x32xf32>
      %50 = tpu.concatenate %49, %arg13 in 1 : vector<2x32xf32>, vector<2x32xf32> -> vector<2x64xf32>
      %cst_27 = arith.constant dense<0.000000e+00> : vector<2x128xf32>
      %51 = tpu.matmul %50, %3, %cst_27 {dimension_numbers = #tpu.dot_dimension_numbers<[1], [0], [0], [1], [0, 0, 1, 1], [], []>} : vector<2x64xf32>, vector<64x128xf32>, vector<2x128xf32> -> vector<2x128xf32>
      %52 = vector.broadcast %4 : vector<1x128xf32> to vector<2x128xf32>
      %53 = arith.addf %51, %52 : vector<2x128xf32>
      %54 = vector.extract_strided_slice %53 {offsets = [0, 0], sizes = [2, 32], strides = [1, 1]} : vector<2x128xf32> to vector<2x32xf32>
      %55 = arith.negf %54 : vector<2x32xf32>
      %56 = math.exp %55 : vector<2x32xf32>
      %cst_28 = arith.constant 1.000000e+00 : f32
      %57 = vector.broadcast %cst_28 : f32 to vector<2x32xf32>
      %58 = arith.addf %57, %56 : vector<2x32xf32>
      %59 = arith.divf %57, %58 : vector<2x32xf32>
      %60 = vector.extract_strided_slice %53 {offsets = [0, 32], sizes = [2, 32], strides = [1, 1]} : vector<2x128xf32> to vector<2x32xf32>
      %61 = arith.negf %60 : vector<2x32xf32>
      %62 = math.exp %61 : vector<2x32xf32>
      %cst_29 = arith.constant 1.000000e+00 : f32
      %63 = vector.broadcast %cst_29 : f32 to vector<2x32xf32>
      %64 = arith.addf %63, %62 : vector<2x32xf32>
      %65 = arith.divf %63, %64 : vector<2x32xf32>
      %66 = vector.extract_strided_slice %53 {offsets = [0, 64], sizes = [2, 32], strides = [1, 1]} : vector<2x128xf32> to vector<2x32xf32>
      %67 = math.tanh %66 : vector<2x32xf32>
      %68 = vector.extract_strided_slice %53 {offsets = [0, 96], sizes = [2, 32], strides = [1, 1]} : vector<2x128xf32> to vector<2x32xf32>
      %69 = arith.negf %68 : vector<2x32xf32>
      %70 = math.exp %69 : vector<2x32xf32>
      %cst_30 = arith.constant 1.000000e+00 : f32
      %71 = vector.broadcast %cst_30 : f32 to vector<2x32xf32>
      %72 = arith.addf %71, %70 : vector<2x32xf32>
      %73 = arith.divf %71, %72 : vector<2x32xf32>
      %74 = arith.mulf %65, %arg14 : vector<2x32xf32>
      %75 = arith.mulf %59, %67 : vector<2x32xf32>
      %76 = arith.addf %74, %75 : vector<2x32xf32>
      %77 = math.tanh %76 : vector<2x32xf32>
      %78 = arith.mulf %73, %77 : vector<2x32xf32>
      %79 = vector.shape_cast %78 : vector<2x32xf32> to vector<2x1x32xf32>
      "tpu.trace_start"() <{level = 10 : i32, message = "bqk,bsk->bqs"}> : () -> ()
      %cst_31 = arith.constant dense<0.000000e+00> : vector<2x1x2xf32>
      %80 = tpu.matmul %79, %0, %cst_31 {dimension_numbers = #tpu.dot_dimension_numbers<[2], [2], [1], [1], [0, 0, 0, 1, 1, 1], [0], [0]>} : vector<2x1x32xf32>, vector<2x2x32xf32>, vector<2x1x2xf32> -> vector<2x1x2xf32>
      "tpu.trace_stop"() : () -> ()
      %81 = vector.shape_cast %80 : vector<2x1x2xf32> to vector<2x2xf32>
      %cst_32 = arith.constant -9.99999971E-10 : f32
      %82 = vector.broadcast %cst_32 : f32 to vector<2x2xf32>
      %83 = arith.select %10, %82, %81 : vector<2x2xi1>, vector<2x2xf32>
      %cst_33 = arith.constant dense<0xFF800000> : vector<2xf32>
      %84 = vector.multi_reduction <maximumf>, %83, %cst_33 [1] : vector<2x2xf32> to vector<2xf32>
      %cst_34 = arith.constant 0xFF800000 : f32
      %85 = vector.broadcast %cst_34 : f32 to vector<2xf32>
      %86 = arith.maximumf %85, %84 : vector<2xf32>
      %87 = vector.shape_cast %86 : vector<2xf32> to vector<2x1xf32>
      %88 = vector.broadcast %87 : vector<2x1xf32> to vector<2x2xf32>
      %89 = arith.subf %83, %88 : vector<2x2xf32>
      %90 = math.exp %89 : vector<2x2xf32>
      %cst_35 = arith.constant dense<0.000000e+00> : vector<2xf32>
      %91 = vector.multi_reduction <add>, %90, %cst_35 [1] : vector<2x2xf32> to vector<2xf32>
      %92 = vector.shape_cast %91 : vector<2xf32> to vector<2x1xf32>
      %93 = vector.broadcast %92 : vector<2x1xf32> to vector<2x2xf32>
      %94 = arith.divf %90, %93 : vector<2x2xf32>
      %95 = vector.shape_cast %94 : vector<2x2xf32> to vector<2x1x2xf32>
      "tpu.trace_start"() <{level = 10 : i32, message = "bqs,bsv->bqv"}> : () -> ()
      %cst_36 = arith.constant dense<0.000000e+00> : vector<2x1x32xf32>
      %96 = tpu.matmul %95, %1, %cst_36 {dimension_numbers = #tpu.dot_dimension_numbers<[2], [1], [1], [2], [0, 0, 0, 1, 1, 2], [0], [0]>} : vector<2x1x2xf32>, vector<2x2x32xf32>, vector<2x1x32xf32> -> vector<2x1x32xf32>
      "tpu.trace_stop"() : () -> ()
      %97 = vector.shape_cast %96 : vector<2x1x32xf32> to vector<2x32xf32>
      %98 = tpu.concatenate %78, %97 in 1 : vector<2x32xf32>, vector<2x32xf32> -> vector<2x64xf32>
      %cst_37 = arith.constant dense<0.000000e+00> : vector<2x30xf32>
      %99 = tpu.matmul %98, %5, %cst_37 {dimension_numbers = #tpu.dot_dimension_numbers<[1], [0], [0], [1], [0, 0, 1, 1], [], []>} : vector<2x64xf32>, vector<64x30xf32>, vector<2x30xf32> -> vector<2x30xf32>
      %100 = vector.broadcast %6 : vector<1x30xf32> to vector<2x30xf32>
      %101 = arith.addf %99, %100 : vector<2x30xf32>
      %102 = arith.index_cast %arg10 : i32 to index
      %c0_38 = arith.constant 0 : index
      %c0_39 = arith.constant 0 : index
      %103 = vector.load %arg9[%102, %c0_38, %c0_39] : memref<8x2x30xf32, #tpu.memory_space<vmem>>, vector<1x2x30xf32>
      %104 = vector.shape_cast %103 : vector<1x2x30xf32> to vector<2x30xf32>
      %105 = vector.shape_cast %101 : vector<2x30xf32> to vector<1x2x30xf32>
      tpu.vector_store %arg9[%102, %c0_38, %c0_39], %105 {strides = array<i32>} : memref<8x2x30xf32, #tpu.memory_space<vmem>>, vector<1x2x30xf32>,
      scf.yield %49, %47, %78, %76, %97 : vector<2x32xf32>, vector<2x32xf32>, vector<2x32xf32>, vector<2x32xf32>, vector<2x32xf32>
    }
    %c8_i32_20 = arith.constant 8 : i32
    return
  }
}

</mosaic_0001>

<bundles_post_ra>
// kernel: seq2seq_forward.11
= control target key start
LH: loop header
LB: loop body
LE: loop exit
PB: predicated region body
PF: predicated region fallthrough
CT: control target
= control target key end

     0   :  { %v153_v2 = vmov 0.0   ;;  %vm32_vm0 = vcmask 64512   ;;  %v22_v7 = vlaneseq  ;;  %s219_s1 = inlined_call_operand.vmem [shape: f32[8,256], index: 1, kind: input, shape index: {}]   ;;  %s220_s0 = inlined_call_operand.vmem [shape: f32[32,8], index: 0, kind: input, shape index: {}]   ;;  %s221_s2 = inlined_call_operand.vmem [shape: f32[1,256], index: 2, kind: input, shape index: {}]   ;;  %s222_s3 = inlined_call_operand.vmem [shape: f32[32,256], index: 3, kind: output, shape index: {}]  }
   0x1   :  { %v19_v0 = vld [vmem:[%s219_s1 + $0x8] sm:$0xff]  ;;  %v18_v1 = vld [vmem:[%s219_s1] sm:$0xff]  ;;  %109 = vmatprep.mubr.f32.mxu0 %v153_v2  ;;  %121 = vmatprep.mubr.f32.mxu1 %v153_v2  ;;  %v16_v4 = vld [vmem:[%s220_s0 + $0x10] sm:$0xff] }
   0x2   :  { %v14_v3 = vld [vmem:[%s220_s0] sm:$0xff]  ;;  %45 = vmatprep.subr.mxu0 %v19_v0  ;;  %150 = vmatprep.subr.mxu1 %v19_v0  ;;  %v15_v5 = vld [vmem:[%s220_s0 + $0x8] sm:$0xff]  ;;  %v17_v6 = vld [vmem:[%s220_s0 + $0x18] sm:$0xff]  ;;  %v23_v8 = vshrl.u32 %v22_v7, 7 }
   0x3   :  { %46 = vmatpush1.msra.mxu0 %v18_v1  ;;  %151 = vmatpush1.msra.mxu1 %v18_v1  ;;  %v20_v10 = vld [vmem:[%s221_s2] sm:$0x3] }
   0x4   :  { %146 = vmatmul.mubr.msk.f32.vlgmr.msra.gmra.mrb[0].mxu0 %vm32_vm0, %v14_v3  ;;  %148 = vmatmul.mubr.msk.f32.vlgmr.msra.gmra.mrb[0].mxu1 %vm32_vm0, %v16_v4  ;;  %v24_v9 = vsub.s32 0, %v23_v8  ;;  %v28_v11 = vsub.s32 1, %v23_v8 }
   0x5   :  { %115 = vmatprep.mubr.f32.mxu0 %v153_v2  ;;  %127 = vmatprep.mubr.f32.mxu1 %v153_v2 }
   0x6   :  { %v25_v12 = vrot.slane %v20_v10, %v24_v9  ;;  %v29_v13 = vrot.slane %v20_v10, %v28_v11 }
   0x8   :  { %147 = vmatmul.mubr.msk.f32.gmra.mrb[2].mxu0 %vm32_vm0, %v15_v5  ;;  %149 = vmatmul.mubr.msk.f32.gmra.mrb[2].mxu1 %vm32_vm0, %v17_v6 }
  0xd7   :  { %v111_v14 = vpop.f32.mrb[0].mxu0  ;;  %v123_v15 = vpop.f32.mrb[0].mxu1 }
  0xd8   :  { %v112_v16 = vadd.f32 %v111_v14, %v25_v12  ;;  %v124_v17 = vadd.f32 %v123_v15, %v25_v12  ;;  %v113_v18 = vpop.f32.mrb[1].mxu0  ;;  %v125_v19 = vpop.f32.mrb[1].mxu1 }
  0xd9   :  { %v114_v20 = vadd.f32 %v113_v18, %v29_v13  ;;  %v126_v21 = vadd.f32 %v125_v19, %v29_v13 }
  0xda   :  { %134 = vst [vmem:[%s222_s3] sm:$0xff] %v112_v16  ;;  %138 = vst [vmem:[%s222_s3 + $0x20] sm:$0xff] %v124_v17 }
  0xdb   :  { %135 = vst [vmem:[%s222_s3 + $0x8] sm:$0xff] %v114_v20  ;;  %139 = vst [vmem:[%s222_s3 + $0x28] sm:$0xff] %v126_v21  ;;  %v117_v22 = vpop.f32.mrb[2].mxu0  ;;  %v129_v23 = vpop.f32.mrb[2].mxu1 }
  0xdc   :  { %v118_v24 = vadd.f32 %v117_v22, %v25_v12  ;;  %v130_v25 = vadd.f32 %v129_v23, %v25_v12  ;;  %v119_v26 = vpop.f32.mrb[3].mxu0  ;;  %v131_v27 = vpop.f32.mrb[3].mxu1 }
  0xdd   :  { %v120_v28 = vadd.f32 %v119_v26, %v29_v13  ;;  %v132_v29 = vadd.f32 %v131_v27, %v29_v13 }
  0xde   :  { %136 = vst [vmem:[%s222_s3 + $0x10] sm:$0xff] %v118_v24  ;;  %140 = vst [vmem:[%s222_s3 + $0x30] sm:$0xff] %v130_v25 }
  0xdf   :  { %137 = vst [vmem:[%s222_s3 + $0x18] sm:$0xff] %v120_v28  ;;  %141 = vst [vmem:[%s222_s3 + $0x38] sm:$0xff] %v132_v29 }

// kernel: seq2seq_forward.12
= control target key start
LH: loop header
LB: loop body
LE: loop exit
PB: predicated region body
PF: predicated region fallthrough
CT: control target
= control target key end

     0   :  { %s507_s9 = smov 0   ;;  %s560_s0 = inlined_call_operand.vmem [shape: f32[2,16,2,128], index: 0, kind: input, shape index: {}]   ;;  %s561_s1 = inlined_call_operand.vmem [shape: f32[2,32,128], index: 1, kind: input, shape index: {}]   ;;  %s562_s2 = inlined_call_operand.vmem [shape: f32[2,16,2,32], index: 2, kind: output, shape index: {}]  }
   0x1 LB: > { %s369_s10 = sadd.s32 4294967295, %s473_s9   ;;  %p373_p0 = scmp.ge.s32.totalorder %s473_s9, 1  ;;  %s473_s9 = sphi %s507_s9, %s12_s9  }
   0x2   : > { %p122_p1 = scmp.lt.s32.totalorder %s473_s9, 3 }
   0x4   : > { %p123_p2 = pnand %p373_p0, %p122_p1 }
   0x5   : > { %p149_p3 = scmp.lt.s32.totalorder (!%p123_p2), %s369_s10, 1  ;;  %v475_v4 = vmov (!%p123_p2), 0.0   ;;  %v479_v5 = vmov (!%p123_p2), 0.0   ;;  %s533_s21 = smov (!%p123_p2), 0  }
   0x6   : > { %126 = sbr.rel (%p123_p2) target bundleno = 837 (0x345), region = 28 }
   0xd   : > { %s564_s10 = smov (!%p149_p3, %s369_s10), 1 }
   0xe   : > { %s515_s11 = sshll.u32 %s564_s10, 5 }
   0xf   : > { %s153_s14 = scalar_lea.vmem %s560_s0, %s515_s11  ;;  %s158_s17 = scalar_lea.vmem %s561_s1, %s515_s11 }
  0x10   : > { %s163_s20 = scalar_lea.vmem %s562_s2, %s515_s11  ;;  %v529_v0 = vld [vmem:[%s158_s17] sm:$0xff]  ;;  %v531_v1 = vld [vmem:[%s158_s17 + $0x8] sm:$0xff]  ;;  %v166_v2 = vld [vmem:[%s158_s17 + $0x10] sm:$0xff] }
  0x11   : > { %v167_v3 = vld [vmem:[%s158_s17 + $0x18] sm:$0xff] }
  0x12 LB: >> { %v405_v6 = vpack.c.bf16 %v531_v1, %v529_v0  ;;  %v487_v7 = vmov 0.0|0.0   ;;  %s488_s22 = smov 32   ;;  %v408_v8 = vpack.c.bf16 %v167_v3, %v166_v2  ;;  %vm489_vm0 = vmmov 0   ;;  %s380_s23 = sshll.u32 %s485_s21, 1  ;;  %s485_s21 = sphi %s533_s21, %s173_s21   ;;  %v481_v5 = vphi %v479_v5, %v279_v5   ;;  %v477_v4 = vphi %v475_v4, %v273_v4  }
  0x13   : >> { %404 = vmatprep.subr.bf16.mxu0 %v487_v7  ;;  %180 = vrot.lane.b32.xlu0 %v481_v5, %s488_s22  ;;  %v490_v9 = vmov 0.0   ;;  %vm182_vm1 = vcmask 261120   ;;  %s177_s26 = scalar_lea.vmem %s153_s14, %s380_s23  ;;  %s491_s27 = smov 64   ;;  %vm285_vm2 = vcmask 254976  }
  0x14   : >> { %406 = vmatpush3.bf16.msra.mxu0 %v405_v6  ;;  %401 = vmatprep.mubr.msk.f32.mxu0 %vm489_vm0, %v490_v9  ;;  %v178_v11 = vld [vmem:[%s177_s26] sm:$0x3]  ;;  %s284_s30 = scalar_lea.vmem %s163_s20, %s380_s23  ;;  %s173_s21 = sadd.s32 1, %s485_s21  }
  0x15   : >> { %407 = vmatprep.subr.bf16.mxu0 %v487_v7  ;;  %p170_p4 = scmp.ge.s32.totalorder %s173_s21, 16  }
  0x18   : >> { %409 = vmatpush3.bf16.msra.mxu0 %v408_v8 }
  0x85   : >> { %v181_v10 = vpop.permute.xlu0 %180 }
  0x86   : >> { %402 = vmatmul.mubr.msk.f32.vlgmr.msra.gmra.mrb[0].mxu0 %vm182_vm1, %v181_v10 }
 0x159   : >> { %v251_v12 = vpop.f32.mrb[0].mxu0 }
 0x15a   : >> { %v255_v13 = vadd.f32 %v251_v12, %v178_v11  ;;  %v403_v14 = vpop.f32.mrb[1].mxu0 }
 0x15c   : >> { %447 = vtanh.f32 %v255_v13  ;;  %v382_v16 = vmul.f32 -1.442695, %v255_v13 }
 0x15e   : >> { %449 = vpow2.f32 %v382_v16 }
 0x166   : >> { %v448_v15 = vpop.eup %447 }
 0x167   : >> { %265 = vrot.lane.b32.xlu0 %v448_v15, %s491_s27 }
 0x168   : >> { %v450_v17 = vpop.eup %449 }
 0x169   : >> { %v259_v18 = vadd.f32 1.0, %v450_v17 }
 0x16b   : >> { %451 = vrcp.f32 %v259_v18 }
 0x175   : >> { %v452_v19 = vpop.eup %451 }
 0x176   : >> { %v263_v22 = vmul.f32 %v477_v4, %v452_v19 }
 0x1d9   : >> { %v266_v20 = vpop.permute.xlu0 %265 }
 0x1da   : >> { %v268_v21 = vmul.f32 %v452_v19, %v266_v20 }
 0x1dc   : >> { %270 = vrot.lane.b32.xlu1 %v268_v21, %s488_s22 }
 0x24e   : >> { %v271_v23 = vpop.permute.xlu1 %270 }
 0x24f   : >> { %v273_v4 = vadd.f32 %v271_v23, %v263_v22  }
 0x251   : >> { %453 = vtanh.f32 %v273_v4 }
 0x25b   : >> { %v454_v24 = vpop.eup %453 }
 0x25c   : >> { %276 = vrot.lane.b32.xlu1 %v454_v24, %s491_s27 }
 0x2ce   : >> { %v277_v25 = vpop.permute.xlu1 %276 }
 0x2cf   : >> { %v279_v5 = vmul.f32 %v452_v19, %v277_v25  }
 0x2d1   : >> { %281 = vrot.lane.b32.xlu0 %v279_v5, %s488_s22 }
 0x33e   : > { %172 = sbr.rel (!%p170_p4) target bundleno = 18 (0x12), region = 70 }
 0x343   : >> { %v282_v26 = vpop.permute.xlu0 %281 }
 0x344   : >> { %286 = vst.msk [vmem:[%s284_s30] sm:$0x3] %vm285_vm2, %v282_v26 }
 0x345 PF: > { %s12_s9 = sadd.s32 1, %s473_s9  }
 0x346   : > { %p9_p5 = scmp.ge.s32.totalorder %s12_s9, 4  }
 0x348   :  { %11 = sbr.rel (!%p9_p5) target bundleno = 1 (0x1), region = 81 }

// kernel: seq2seq_forward.13
= control target key start
LH: loop header
LB: loop body
LE: loop exit
PB: predicated region body
PF: predicated region fallthrough
CT: control target
= control target key end

     0   :  { %v163_v3 = vmov 0.0   ;;  %vm44_vm0 = vcmask 523264   ;;  %v34_v27 = vlaneseq  ;;  %s253_s1 = inlined_call_operand.vmem [shape: f32[64,256], index: 1, kind: input, shape index: {}]   ;;  %s254_s0 = inlined_call_operand.vmem [shape: f32[16,64], index: 0, kind: input, shape index: {}]   ;;  %s255_s2 = inlined_call_operand.vmem [shape: f32[1,256], index: 2, kind: input, shape index: {}]   ;;  %s256_s3 = inlined_call_operand.vmem [shape: f32[16,256], index: 3, kind: output, shape index: {}]  }
   0x1   :  { %v17_v0 = vld [vmem:[%s253_s1 + $0x8] sm:$0xff]  ;;  %v19_v1 = vld [vmem:[%s253_s1 + $0x18] sm:$0xff]  ;;  %v16_v2 = vld [vmem:[%s253_s1] sm:$0xff]  ;;  %115 = vmatprep.mubr.f32.mxu0 %v163_v3  ;;  %121 = vmatprep.mubr.f32.mxu1 %v163_v3 }
   0x2   :  { %v138_v4 = vpack.c.bf16 %v19_v1, %v17_v0  ;;  %v18_v5 = vld [vmem:[%s253_s1 + $0x10] sm:$0xff]  ;;  %v21_v6 = vld [vmem:[%s253_s1 + $0x28] sm:$0xff]  ;;  %v23_v7 = vld [vmem:[%s253_s1 + $0x38] sm:$0xff]  ;;  %v35_v28 = vshrl.u32 %v34_v27, 7 }
   0x3   :  { %v140_v8 = vpack.c.bf16 %v18_v5, %v16_v2  ;;  %v142_v9 = vpack.c.bf16 %v23_v7, %v21_v6  ;;  %v20_v10 = vld [vmem:[%s253_s1 + $0x20] sm:$0xff]  ;;  %v22_v11 = vld [vmem:[%s253_s1 + $0x30] sm:$0xff]  ;;  %v25_v12 = vld [vmem:[%s253_s1 + $0x48] sm:$0xff] }
   0x4   :  { %139 = vmatprep.subr.bf16.mxu0 %v138_v4  ;;  %154 = vmatprep.subr.bf16.mxu1 %v138_v4  ;;  %v27_v13 = vld [vmem:[%s253_s1 + $0x58] sm:$0xff]  ;;  %v144_v14 = vpack.c.bf16 %v22_v11, %v20_v10  ;;  %v24_v16 = vld [vmem:[%s253_s1 + $0x40] sm:$0xff]  ;;  %v26_v17 = vld [vmem:[%s253_s1 + $0x50] sm:$0xff]  ;;  %v36_v29 = vsub.s32 0, %v35_v28  ;;  %v40_v31 = vsub.s32 1, %v35_v28 }
   0x5   :  { %141 = vmatpush1.bf16.msra.mxu0 %v140_v8  ;;  %158 = vmatpush1.bf16.msra.mxu1 %v140_v8  ;;  %v146_v15 = vpack.c.bf16 %v27_v13, %v25_v12  ;;  %v29_v18 = vld [vmem:[%s253_s1 + $0x68] sm:$0xff]  ;;  %v31_v19 = vld [vmem:[%s253_s1 + $0x78] sm:$0xff]  ;;  %v148_v20 = vpack.c.bf16 %v26_v17, %v24_v16  ;;  %v28_v22 = vld [vmem:[%s253_s1 + $0x60] sm:$0xff] }
   0x6   :  { %143 = vmatprep.subr.bf16.mxu0 %v142_v9  ;;  %155 = vmatprep.subr.bf16.mxu1 %v142_v9  ;;  %v150_v21 = vpack.c.bf16 %v31_v19, %v29_v18  ;;  %v30_v23 = vld [vmem:[%s253_s1 + $0x70] sm:$0xff]  ;;  %v14_v25 = vld [vmem:[%s254_s0] sm:$0xff]  ;;  %v15_v26 = vld [vmem:[%s254_s0 + $0x8] sm:$0xff] }
   0x7   :  { %v152_v24 = vpack.c.bf16 %v30_v23, %v28_v22  ;;  %v32_v30 = vld [vmem:[%s255_s2] sm:$0x3] }
   0x8   :  { %v37_v32 = vrot.slane %v32_v30, %v36_v29  ;;  %v41_v33 = vrot.slane %v32_v30, %v40_v31 }
   0x9   :  { %145 = vmatpush1.bf16.msra.mxu0 %v144_v14  ;;  %159 = vmatpush1.bf16.msra.mxu1 %v144_v14 }
   0xa   :  { %147 = vmatprep.subr.bf16.mxu0 %v146_v15  ;;  %156 = vmatprep.subr.bf16.mxu1 %v146_v15 }
   0xd   :  { %149 = vmatpush1.bf16.msra.mxu0 %v148_v20  ;;  %160 = vmatpush1.bf16.msra.mxu1 %v148_v20 }
   0xe   :  { %151 = vmatprep.subr.bf16.mxu0 %v150_v21  ;;  %157 = vmatprep.subr.bf16.mxu1 %v150_v21 }
  0x11   :  { %153 = vmatpush1.bf16.msra.mxu0 %v152_v24  ;;  %161 = vmatpush1.bf16.msra.mxu1 %v152_v24 }
  0x14   :  { %136 = vmatmul.mubr.msk.f32.vlgmr.msra.gmra.mrb[0].mxu0 %vm44_vm0, %v14_v25  ;;  %137 = vmatmul.mubr.msk.f32.vlgmr.msra.gmra.mrb[0].mxu1 %vm44_vm0, %v15_v26 }
  0xe7   :  { %v117_v34 = vpop.f32.mrb[0].mxu0  ;;  %v123_v35 = vpop.f32.mrb[0].mxu1 }
  0xe8   :  { %v118_v36 = vadd.f32 %v117_v34, %v37_v32  ;;  %v124_v37 = vadd.f32 %v123_v35, %v37_v32  ;;  %v119_v38 = vpop.f32.mrb[1].mxu0  ;;  %v125_v39 = vpop.f32.mrb[1].mxu1 }
  0xe9   :  { %v120_v40 = vadd.f32 %v119_v38, %v41_v33  ;;  %v126_v41 = vadd.f32 %v125_v39, %v41_v33 }
  0xea   :  { %128 = vst [vmem:[%s256_s3] sm:$0xff] %v118_v36  ;;  %130 = vst [vmem:[%s256_s3 + $0x10] sm:$0xff] %v124_v37 }
  0xeb   :  { %129 = vst [vmem:[%s256_s3 + $0x8] sm:$0xff] %v120_v40  ;;  %131 = vst [vmem:[%s256_s3 + $0x18] sm:$0xff] %v126_v41 }

// kernel: seq2seq_forward.14
= control target key start
LH: loop header
LB: loop body
LE: loop exit
PB: predicated region body
PF: predicated region fallthrough
CT: control target
= control target key end

     0   :  { %s507_s9 = smov 0   ;;  %s551_s0 = inlined_call_operand.vmem [shape: f32[2,8,2,128], index: 0, kind: input, shape index: {}]   ;;  %s552_s1 = inlined_call_operand.vmem [shape: f32[2,32,128], index: 1, kind: input, shape index: {}]   ;;  %s553_s2 = inlined_call_operand.vmem [shape: f32[2,8,2,32], index: 2, kind: output, shape index: {}]  }
   0x1 LB: > { %s369_s10 = sadd.s32 4294967295, %s473_s9   ;;  %p373_p0 = scmp.ge.s32.totalorder %s473_s9, 1  ;;  %s473_s9 = sphi %s507_s9, %s12_s9  }
   0x2   : > { %p122_p1 = scmp.lt.s32.totalorder %s473_s9, 3 }
   0x4   : > { %p123_p2 = pnand %p373_p0, %p122_p1 }
   0x5   : > { %p149_p3 = scmp.lt.s32.totalorder (!%p123_p2), %s369_s10, 1  ;;  %v475_v4 = vmov (!%p123_p2), 0.0   ;;  %v479_v5 = vmov (!%p123_p2), 0.0   ;;  %s532_s22 = smov (!%p123_p2), 0  }
   0x6   : > { %126 = sbr.rel (%p123_p2) target bundleno = 837 (0x345), region = 28 }
   0xd   : > { %s555_s10 = smov (!%p149_p3, %s369_s10), 1 }
   0xe   : > { %s385_s11 = sshll.u32 %s555_s10, 4  ;;  %s386_s12 = sshll.u32 %s555_s10, 5 }
   0xf   : > { %s518_s15 = scalar_lea.vmem %s551_s0, %s385_s11  ;;  %s158_s18 = scalar_lea.vmem %s552_s1, %s386_s12 }
  0x10   : > { %s526_s21 = scalar_lea.vmem %s553_s2, %s385_s11  ;;  %v528_v0 = vld [vmem:[%s158_s18] sm:$0xff]  ;;  %v530_v1 = vld [vmem:[%s158_s18 + $0x8] sm:$0xff]  ;;  %v166_v2 = vld [vmem:[%s158_s18 + $0x10] sm:$0xff] }
  0x11   : > { %v167_v3 = vld [vmem:[%s158_s18 + $0x18] sm:$0xff] }
  0x12 LB: >> { %v405_v6 = vpack.c.bf16 %v530_v1, %v528_v0  ;;  %v487_v7 = vmov 0.0|0.0   ;;  %s488_s23 = smov 32   ;;  %v408_v8 = vpack.c.bf16 %v167_v3, %v166_v2  ;;  %vm489_vm0 = vmmov 0   ;;  %s380_s24 = sshll.u32 %s485_s22, 1  ;;  %s485_s22 = sphi %s532_s22, %s173_s22   ;;  %v481_v5 = vphi %v479_v5, %v279_v5   ;;  %v477_v4 = vphi %v475_v4, %v273_v4  }
  0x13   : >> { %404 = vmatprep.subr.bf16.mxu0 %v487_v7  ;;  %180 = vrot.lane.b32.xlu0 %v481_v5, %s488_s23  ;;  %v490_v9 = vmov 0.0   ;;  %vm182_vm1 = vcmask 261120   ;;  %s177_s25 = scalar_lea.vmem %s518_s15, %s380_s24  ;;  %s491_s26 = smov 64   ;;  %vm285_vm2 = vcmask 254976  }
  0x14   : >> { %406 = vmatpush3.bf16.msra.mxu0 %v405_v6  ;;  %401 = vmatprep.mubr.msk.f32.mxu0 %vm489_vm0, %v490_v9  ;;  %v178_v11 = vld [vmem:[%s177_s25] sm:$0x3]  ;;  %s284_s27 = scalar_lea.vmem %s526_s21, %s380_s24  ;;  %s173_s22 = sadd.s32 1, %s485_s22  }
  0x15   : >> { %407 = vmatprep.subr.bf16.mxu0 %v487_v7  ;;  %p170_p4 = scmp.ge.s32.totalorder %s173_s22, 8  }
  0x18   : >> { %409 = vmatpush3.bf16.msra.mxu0 %v408_v8 }
  0x85   : >> { %v181_v10 = vpop.permute.xlu0 %180 }
  0x86   : >> { %402 = vmatmul.mubr.msk.f32.vlgmr.msra.gmra.mrb[0].mxu0 %vm182_vm1, %v181_v10 }
 0x159   : >> { %v251_v12 = vpop.f32.mrb[0].mxu0 }
 0x15a   : >> { %v255_v13 = vadd.f32 %v251_v12, %v178_v11  ;;  %v403_v14 = vpop.f32.mrb[1].mxu0 }
 0x15c   : >> { %447 = vtanh.f32 %v255_v13  ;;  %v382_v16 = vmul.f32 -1.442695, %v255_v13 }
 0x15e   : >> { %449 = vpow2.f32 %v382_v16 }
 0x166   : >> { %v448_v15 = vpop.eup %447 }
 0x167   : >> { %265 = vrot.lane.b32.xlu0 %v448_v15, %s491_s26 }
 0x168   : >> { %v450_v17 = vpop.eup %449 }
 0x169   : >> { %v259_v18 = vadd.f32 1.0, %v450_v17 }
 0x16b   : >> { %451 = vrcp.f32 %v259_v18 }
 0x175   : >> { %v452_v19 = vpop.eup %451 }
 0x176   : >> { %v263_v22 = vmul.f32 %v477_v4, %v452_v19 }
 0x1d9   : >> { %v266_v20 = vpop.permute.xlu0 %265 }
 0x1da   : >> { %v268_v21 = vmul.f32 %v452_v19, %v266_v20 }
 0x1dc   : >> { %270 = vrot.lane.b32.xlu1 %v268_v21, %s488_s23 }
 0x24e   : >> { %v271_v23 = vpop.permute.xlu1 %270 }
 0x24f   : >> { %v273_v4 = vadd.f32 %v271_v23, %v263_v22  }
 0x251   : >> { %453 = vtanh.f32 %v273_v4 }
 0x25b   : >> { %v454_v24 = vpop.eup %453 }
 0x25c   : >> { %276 = vrot.lane.b32.xlu1 %v454_v24, %s491_s26 }
 0x2ce   : >> { %v277_v25 = vpop.permute.xlu1 %276 }
 0x2cf   : >> { %v279_v5 = vmul.f32 %v452_v19, %v277_v25  }
 0x2d1   : >> { %281 = vrot.lane.b32.xlu0 %v279_v5, %s488_s23 }
 0x33e   : > { %172 = sbr.rel (!%p170_p4) target bundleno = 18 (0x12), region = 70 }
 0x343   : >> { %v282_v26 = vpop.permute.xlu0 %281 }
 0x344   : >> { %286 = vst.msk [vmem:[%s284_s27] sm:$0x3] %vm285_vm2, %v282_v26 }
 0x345 PF: > { %s12_s9 = sadd.s32 1, %s473_s9  }
 0x346   : > { %p9_p5 = scmp.ge.s32.totalorder %s12_s9, 4  }
 0x348   :  { %11 = sbr.rel (!%p9_p5) target bundleno = 1 (0x1), region = 81 }

// kernel: seq2seq_forward.15
= control target key start
LH: loop header
LB: loop body
LE: loop exit
PB: predicated region body
PF: predicated region fallthrough
CT: control target
= control target key end

     0   :  { %v142_v3 = vmov 0.0   ;;  %vm43_vm0 = vcmask 523264   ;;  %v33_v26 = vlaneseq  ;;  %s223_s1 = inlined_call_operand.vmem [shape: f32[64,256], index: 1, kind: input, shape index: {}]   ;;  %s224_s0 = inlined_call_operand.vmem [shape: f32[8,64], index: 0, kind: input, shape index: {}]   ;;  %s225_s2 = inlined_call_operand.vmem [shape: f32[1,256], index: 2, kind: input, shape index: {}]   ;;  %s226_s3 = inlined_call_operand.vmem [shape: f32[8,256], index: 3, kind: output, shape index: {}]  }
   0x1   :  { %v16_v0 = vld [vmem:[%s223_s1 + $0x8] sm:$0xff]  ;;  %v18_v1 = vld [vmem:[%s223_s1 + $0x18] sm:$0xff]  ;;  %v15_v2 = vld [vmem:[%s223_s1] sm:$0xff]  ;;  %111 = vmatprep.mubr.f32.mxu0 %v142_v3 }
   0x2   :  { %v125_v4 = vpack.c.bf16 %v18_v1, %v16_v0  ;;  %v17_v5 = vld [vmem:[%s223_s1 + $0x10] sm:$0xff]  ;;  %v20_v6 = vld [vmem:[%s223_s1 + $0x28] sm:$0xff]  ;;  %v22_v7 = vld [vmem:[%s223_s1 + $0x38] sm:$0xff]  ;;  %v34_v27 = vshrl.u32 %v33_v26, 7 }
   0x3   :  { %v127_v8 = vpack.c.bf16 %v17_v5, %v15_v2  ;;  %v129_v9 = vpack.c.bf16 %v22_v7, %v20_v6  ;;  %v19_v10 = vld [vmem:[%s223_s1 + $0x20] sm:$0xff]  ;;  %v21_v11 = vld [vmem:[%s223_s1 + $0x30] sm:$0xff]  ;;  %v24_v12 = vld [vmem:[%s223_s1 + $0x48] sm:$0xff] }
   0x4   :  { %126 = vmatprep.subr.bf16.mxu0 %v125_v4  ;;  %v26_v13 = vld [vmem:[%s223_s1 + $0x58] sm:$0xff]  ;;  %v131_v14 = vpack.c.bf16 %v21_v11, %v19_v10  ;;  %v23_v16 = vld [vmem:[%s223_s1 + $0x40] sm:$0xff]  ;;  %v25_v17 = vld [vmem:[%s223_s1 + $0x50] sm:$0xff]  ;;  %v35_v28 = vsub.s32 0, %v34_v27  ;;  %v39_v30 = vsub.s32 1, %v34_v27 }
   0x5   :  { %128 = vmatpush1.bf16.msra.mxu0 %v127_v8  ;;  %v133_v15 = vpack.c.bf16 %v26_v13, %v24_v12  ;;  %v28_v18 = vld [vmem:[%s223_s1 + $0x68] sm:$0xff]  ;;  %v30_v19 = vld [vmem:[%s223_s1 + $0x78] sm:$0xff]  ;;  %v135_v20 = vpack.c.bf16 %v25_v17, %v23_v16  ;;  %v27_v22 = vld [vmem:[%s223_s1 + $0x60] sm:$0xff] }
   0x6   :  { %130 = vmatprep.subr.bf16.mxu0 %v129_v9  ;;  %v137_v21 = vpack.c.bf16 %v30_v19, %v28_v18  ;;  %v29_v23 = vld [vmem:[%s223_s1 + $0x70] sm:$0xff]  ;;  %v14_v25 = vld [vmem:[%s224_s0] sm:$0xff] }
   0x7   :  { %v139_v24 = vpack.c.bf16 %v29_v23, %v27_v22  ;;  %v31_v29 = vld [vmem:[%s225_s2] sm:$0x3] }
   0x8   :  { %v36_v31 = vrot.slane %v31_v29, %v35_v28  ;;  %v40_v32 = vrot.slane %v31_v29, %v39_v30 }
   0x9   :  { %132 = vmatpush1.bf16.msra.mxu0 %v131_v14 }
   0xa   :  { %134 = vmatprep.subr.bf16.mxu0 %v133_v15 }
   0xd   :  { %136 = vmatpush1.bf16.msra.mxu0 %v135_v20 }
   0xe   :  { %138 = vmatprep.subr.bf16.mxu0 %v137_v21 }
  0x11   :  { %140 = vmatpush1.bf16.msra.mxu0 %v139_v24 }
  0x14   :  { %124 = vmatmul.mubr.msk.f32.vlgmr.msra.gmra.mrb[0].mxu0 %vm43_vm0, %v14_v25 }
  0xe7   :  { %v113_v33 = vpop.f32.mrb[0].mxu0 }
  0xe8   :  { %v114_v34 = vadd.f32 %v113_v33, %v36_v31  ;;  %v115_v35 = vpop.f32.mrb[1].mxu0 }
  0xe9   :  { %v116_v36 = vadd.f32 %v115_v35, %v40_v32 }
  0xea   :  { %118 = vst [vmem:[%s226_s3] sm:$0xff] %v114_v34 }
  0xeb   :  { %119 = vst [vmem:[%s226_s3 + $0x8] sm:$0xff] %v116_v36 }

// kernel: seq2seq_forward.16
= control target key start
LH: loop header
LB: loop body
LE: loop exit
PB: predicated region body
PF: predicated region fallthrough
CT: control target
= control target key end

     0   :  { %s507_s9 = smov 0   ;;  %s551_s0 = inlined_call_operand.vmem [shape: f32[2,4,2,128], index: 0, kind: input, shape index: {}]   ;;  %s552_s1 = inlined_call_operand.vmem [shape: f32[2,32,128], index: 1, kind: input, shape index: {}]   ;;  %s553_s2 = inlined_call_operand.vmem [shape: f32[2,4,2,32], index: 2, kind: output, shape index: {}]  }
   0x1 LB: > { %s369_s10 = sadd.s32 4294967295, %s473_s9   ;;  %p373_p0 = scmp.ge.s32.totalorder %s473_s9, 1  ;;  %s473_s9 = sphi %s507_s9, %s12_s9  }
   0x2   : > { %p122_p1 = scmp.lt.s32.totalorder %s473_s9, 3 }
   0x4   : > { %p123_p2 = pnand %p373_p0, %p122_p1 }
   0x5   : > { %p149_p3 = scmp.lt.s32.totalorder (!%p123_p2), %s369_s10, 1  ;;  %v475_v4 = vmov (!%p123_p2), 0.0   ;;  %v479_v5 = vmov (!%p123_p2), 0.0   ;;  %s532_s22 = smov (!%p123_p2), 0  }
   0x6   : > { %126 = sbr.rel (%p123_p2) target bundleno = 837 (0x345), region = 28 }
   0xd   : > { %s555_s10 = smov (!%p149_p3, %s369_s10), 1 }
   0xe   : > { %s385_s11 = sshll.u32 %s555_s10, 3  ;;  %s386_s12 = sshll.u32 %s555_s10, 5 }
   0xf   : > { %s518_s15 = scalar_lea.vmem %s551_s0, %s385_s11  ;;  %s158_s18 = scalar_lea.vmem %s552_s1, %s386_s12 }
  0x10   : > { %s526_s21 = scalar_lea.vmem %s553_s2, %s385_s11  ;;  %v528_v0 = vld [vmem:[%s158_s18] sm:$0xff]  ;;  %v530_v1 = vld [vmem:[%s158_s18 + $0x8] sm:$0xff]  ;;  %v166_v2 = vld [vmem:[%s158_s18 + $0x10] sm:$0xff] }
  0x11   : > { %v167_v3 = vld [vmem:[%s158_s18 + $0x18] sm:$0xff] }
  0x12 LB: >> { %v405_v6 = vpack.c.bf16 %v530_v1, %v528_v0  ;;  %v487_v7 = vmov 0.0|0.0   ;;  %s488_s23 = smov 32   ;;  %v408_v8 = vpack.c.bf16 %v167_v3, %v166_v2  ;;  %vm489_vm0 = vmmov 0   ;;  %s380_s24 = sshll.u32 %s485_s22, 1  ;;  %s485_s22 = sphi %s532_s22, %s173_s22   ;;  %v481_v5 = vphi %v479_v5, %v279_v5   ;;  %v477_v4 = vphi %v475_v4, %v273_v4  }
  0x13   : >> { %404 = vmatprep.subr.bf16.mxu0 %v487_v7  ;;  %180 = vrot.lane.b32.xlu0 %v481_v5, %s488_s23  ;;  %v490_v9 = vmov 0.0   ;;  %vm182_vm1 = vcmask 261120   ;;  %s177_s25 = scalar_lea.vmem %s518_s15, %s380_s24  ;;  %s491_s26 = smov 64   ;;  %vm285_vm2 = vcmask 254976  }
  0x14   : >> { %406 = vmatpush3.bf16.msra.mxu0 %v405_v6  ;;  %401 = vmatprep.mubr.msk.f32.mxu0 %vm489_vm0, %v490_v9  ;;  %v178_v11 = vld [vmem:[%s177_s25] sm:$0x3]  ;;  %s284_s27 = scalar_lea.vmem %s526_s21, %s380_s24  ;;  %s173_s22 = sadd.s32 1, %s485_s22  }
  0x15   : >> { %407 = vmatprep.subr.bf16.mxu0 %v487_v7  ;;  %p170_p4 = scmp.ge.s32.totalorder %s173_s22, 4  }
  0x18   : >> { %409 = vmatpush3.bf16.msra.mxu0 %v408_v8 }
  0x85   : >> { %v181_v10 = vpop.permute.xlu0 %180 }
  0x86   : >> { %402 = vmatmul.mubr.msk.f32.vlgmr.msra.gmra.mrb[0].mxu0 %vm182_vm1, %v181_v10 }
 0x159   : >> { %v251_v12 = vpop.f32.mrb[0].mxu0 }
 0x15a   : >> { %v255_v13 = vadd.f32 %v251_v12, %v178_v11  ;;  %v403_v14 = vpop.f32.mrb[1].mxu0 }
 0x15c   : >> { %447 = vtanh.f32 %v255_v13  ;;  %v382_v16 = vmul.f32 -1.442695, %v255_v13 }
 0x15e   : >> { %449 = vpow2.f32 %v382_v16 }
 0x166   : >> { %v448_v15 = vpop.eup %447 }
 0x167   : >> { %265 = vrot.lane.b32.xlu0 %v448_v15, %s491_s26 }
 0x168   : >> { %v450_v17 = vpop.eup %449 }
 0x169   : >> { %v259_v18 = vadd.f32 1.0, %v450_v17 }
 0x16b   : >> { %451 = vrcp.f32 %v259_v18 }
 0x175   : >> { %v452_v19 = vpop.eup %451 }
 0x176   : >> { %v263_v22 = vmul.f32 %v477_v4, %v452_v19 }
 0x1d9   : >> { %v266_v20 = vpop.permute.xlu0 %265 }
 0x1da   : >> { %v268_v21 = vmul.f32 %v452_v19, %v266_v20 }
 0x1dc   : >> { %270 = vrot.lane.b32.xlu1 %v268_v21, %s488_s23 }
 0x24e   : >> { %v271_v23 = vpop.permute.xlu1 %270 }
 0x24f   : >> { %v273_v4 = vadd.f32 %v271_v23, %v263_v22  }
 0x251   : >> { %453 = vtanh.f32 %v273_v4 }
 0x25b   : >> { %v454_v24 = vpop.eup %453 }
 0x25c   : >> { %276 = vrot.lane.b32.xlu1 %v454_v24, %s491_s26 }
 0x2ce   : >> { %v277_v25 = vpop.permute.xlu1 %276 }
 0x2cf   : >> { %v279_v5 = vmul.f32 %v452_v19, %v277_v25  }
 0x2d1   : >> { %281 = vrot.lane.b32.xlu0 %v279_v5, %s488_s23 }
 0x33e   : > { %172 = sbr.rel (!%p170_p4) target bundleno = 18 (0x12), region = 70 }
 0x343   : >> { %v282_v26 = vpop.permute.xlu0 %281 }
 0x344   : >> { %286 = vst.msk [vmem:[%s284_s27] sm:$0x3] %vm285_vm2, %v282_v26 }
 0x345 PF: > { %s12_s9 = sadd.s32 1, %s473_s9  }
 0x346   : > { %p9_p5 = scmp.ge.s32.totalorder %s12_s9, 4  }
 0x348   :  { %11 = sbr.rel (!%p9_p5) target bundleno = 1 (0x1), region = 81 }

// kernel: seq2seq_forward.17
= control target key start
LH: loop header
LB: loop body
LE: loop exit
PB: predicated region body
PF: predicated region fallthrough
CT: control target
= control target key end

     0   :  { %v145_v3 = vmov 0.0   ;;  %vm43_vm0 = vcmask 523264   ;;  %v33_v26 = vlaneseq  ;;  %s223_s1 = inlined_call_operand.vmem [shape: f32[64,256], index: 1, kind: input, shape index: {}]   ;;  %s224_s0 = inlined_call_operand.vmem [shape: f32[4,64], index: 0, kind: input, shape index: {}]   ;;  %s225_s2 = inlined_call_operand.vmem [shape: f32[1,256], index: 2, kind: input, shape index: {}]   ;;  %s226_s3 = inlined_call_operand.vmem [shape: f32[4,256], index: 3, kind: output, shape index: {}]  }
   0x1   :  { %v16_v0 = vld [vmem:[%s223_s1 + $0x8] sm:$0xff]  ;;  %v18_v1 = vld [vmem:[%s223_s1 + $0x18] sm:$0xff]  ;;  %v15_v2 = vld [vmem:[%s223_s1] sm:$0xff]  ;;  %111 = vmatprep.mubr.f32.mxu0 %v145_v3 }
   0x2   :  { %v128_v4 = vpack.c.bf16 %v18_v1, %v16_v0  ;;  %v17_v5 = vld [vmem:[%s223_s1 + $0x10] sm:$0xff]  ;;  %v20_v6 = vld [vmem:[%s223_s1 + $0x28] sm:$0xff]  ;;  %v22_v7 = vld [vmem:[%s223_s1 + $0x38] sm:$0xff]  ;;  %v34_v27 = vshrl.u32 %v33_v26, 7 }
   0x3   :  { %v130_v8 = vpack.c.bf16 %v17_v5, %v15_v2  ;;  %v132_v9 = vpack.c.bf16 %v22_v7, %v20_v6  ;;  %v19_v10 = vld [vmem:[%s223_s1 + $0x20] sm:$0xff]  ;;  %v21_v11 = vld [vmem:[%s223_s1 + $0x30] sm:$0xff]  ;;  %v24_v12 = vld [vmem:[%s223_s1 + $0x48] sm:$0xff] }
   0x4   :  { %129 = vmatprep.subr.bf16.mxu0 %v128_v4  ;;  %v26_v13 = vld [vmem:[%s223_s1 + $0x58] sm:$0xff]  ;;  %v134_v14 = vpack.c.bf16 %v21_v11, %v19_v10  ;;  %v23_v16 = vld [vmem:[%s223_s1 + $0x40] sm:$0xff]  ;;  %v25_v17 = vld [vmem:[%s223_s1 + $0x50] sm:$0xff]  ;;  %v35_v28 = vsub.s32 0, %v34_v27  ;;  %v39_v30 = vsub.s32 1, %v34_v27 }
   0x5   :  { %131 = vmatpush1.bf16.msra.mxu0 %v130_v8  ;;  %v136_v15 = vpack.c.bf16 %v26_v13, %v24_v12  ;;  %v28_v18 = vld [vmem:[%s223_s1 + $0x68] sm:$0xff]  ;;  %v30_v19 = vld [vmem:[%s223_s1 + $0x78] sm:$0xff]  ;;  %v138_v20 = vpack.c.bf16 %v25_v17, %v23_v16  ;;  %v27_v22 = vld [vmem:[%s223_s1 + $0x60] sm:$0xff] }
   0x6   :  { %133 = vmatprep.subr.bf16.mxu0 %v132_v9  ;;  %v140_v21 = vpack.c.bf16 %v30_v19, %v28_v18  ;;  %v29_v23 = vld [vmem:[%s223_s1 + $0x70] sm:$0xff]  ;;  %v14_v25 = vld [vmem:[%s224_s0] sm:$0xf] }
   0x7   :  { %v142_v24 = vpack.c.bf16 %v29_v23, %v27_v22  ;;  %v31_v29 = vld [vmem:[%s225_s2] sm:$0x3] }
   0x8   :  { %v36_v31 = vrot.slane %v31_v29, %v35_v28  ;;  %v40_v32 = vrot.slane %v31_v29, %v39_v30 }
   0x9   :  { %135 = vmatpush1.bf16.msra.mxu0 %v134_v14 }
   0xa   :  { %137 = vmatprep.subr.bf16.mxu0 %v136_v15 }
   0xd   :  { %139 = vmatpush1.bf16.msra.mxu0 %v138_v20 }
   0xe   :  { %141 = vmatprep.subr.bf16.mxu0 %v140_v21 }
  0x11   :  { %143 = vmatpush1.bf16.msra.mxu0 %v142_v24 }
  0x14   :  { %127 = vmatmul.mubr.msk.f32.vlgmr.msra.gmra.mrb[0].mxu0 %vm43_vm0, %v14_v25 }
  0xe7   :  { %v113_v33 = vpop.f32.mrb[0].mxu0 }
  0xe8   :  { %v114_v34 = vadd.f32 %v113_v33, %v36_v31  ;;  %v115_v35 = vpop.f32.mrb[1].mxu0 }
  0xe9   :  { %v116_v36 = vadd.f32 %v115_v35, %v40_v32 }
  0xeb   :  { %v120_v37 = vcombine.low %v114_v34, %v116_v36 }
  0xed   :  { %122 = vst [vmem:[%s226_s3] sm:$0xff] %v120_v37 }

// kernel: seq2seq_forward.18
= control target key start
LH: loop header
LB: loop body
LE: loop exit
PB: predicated region body
PF: predicated region fallthrough
CT: control target
= control target key end

     0   :  { %s507_s9 = smov 0   ;;  %s551_s0 = inlined_call_operand.vmem [shape: f32[2,2,2,128], index: 0, kind: input, shape index: {}]   ;;  %s552_s1 = inlined_call_operand.vmem [shape: f32[2,32,128], index: 1, kind: input, shape index: {}]   ;;  %s553_s2 = inlined_call_operand.vmem [shape: f32[2,2,2,32], index: 2, kind: output, shape index: {}]  }
   0x1 LB: > { %s369_s10 = sadd.s32 4294967295, %s473_s9   ;;  %p373_p0 = scmp.ge.s32.totalorder %s473_s9, 1  ;;  %s473_s9 = sphi %s507_s9, %s12_s9  }
   0x2   : > { %p122_p1 = scmp.lt.s32.totalorder %s473_s9, 3 }
   0x4   : > { %p123_p2 = pnand %p373_p0, %p122_p1 }
   0x5   : > { %p149_p3 = scmp.lt.s32.totalorder (!%p123_p2), %s369_s10, 1  ;;  %v475_v4 = vmov (!%p123_p2), 0.0   ;;  %v479_v5 = vmov (!%p123_p2), 0.0   ;;  %s532_s22 = smov (!%p123_p2), 0  }
   0x6   : > { %126 = sbr.rel (%p123_p2) target bundleno = 837 (0x345), region = 28 }
   0xd   : > { %s555_s10 = smov (!%p149_p3, %s369_s10), 1 }
   0xe   : > { %s385_s11 = sshll.u32 %s555_s10, 2  ;;  %s386_s12 = sshll.u32 %s555_s10, 5 }
   0xf   : > { %s518_s15 = scalar_lea.vmem %s551_s0, %s385_s11  ;;  %s158_s18 = scalar_lea.vmem %s552_s1, %s386_s12 }
  0x10   : > { %s526_s21 = scalar_lea.vmem %s553_s2, %s385_s11  ;;  %v528_v0 = vld [vmem:[%s158_s18] sm:$0xff]  ;;  %v530_v1 = vld [vmem:[%s158_s18 + $0x8] sm:$0xff]  ;;  %v166_v2 = vld [vmem:[%s158_s18 + $0x10] sm:$0xff] }
  0x11   : > { %v167_v3 = vld [vmem:[%s158_s18 + $0x18] sm:$0xff] }
  0x12 LB: >> { %v405_v6 = vpack.c.bf16 %v530_v1, %v528_v0  ;;  %v487_v7 = vmov 0.0|0.0   ;;  %s488_s23 = smov 32   ;;  %v408_v8 = vpack.c.bf16 %v167_v3, %v166_v2  ;;  %vm489_vm0 = vmmov 0   ;;  %s380_s24 = sshll.u32 %s485_s22, 1  ;;  %s485_s22 = sphi %s532_s22, %s173_s22   ;;  %v481_v5 = vphi %v479_v5, %v279_v5   ;;  %v477_v4 = vphi %v475_v4, %v273_v4  }
  0x13   : >> { %404 = vmatprep.subr.bf16.mxu0 %v487_v7  ;;  %180 = vrot.lane.b32.xlu0 %v481_v5, %s488_s23  ;;  %v490_v9 = vmov 0.0   ;;  %vm182_vm1 = vcmask 261120   ;;  %s177_s25 = scalar_lea.vmem %s518_s15, %s380_s24  ;;  %s491_s26 = smov 64   ;;  %vm285_vm2 = vcmask 254976  }
  0x14   : >> { %406 = vmatpush3.bf16.msra.mxu0 %v405_v6  ;;  %401 = vmatprep.mubr.msk.f32.mxu0 %vm489_vm0, %v490_v9  ;;  %v178_v11 = vld [vmem:[%s177_s25] sm:$0x3]  ;;  %s284_s27 = scalar_lea.vmem %s526_s21, %s380_s24  ;;  %s173_s22 = sadd.s32 1, %s485_s22  }
  0x15   : >> { %407 = vmatprep.subr.bf16.mxu0 %v487_v7  ;;  %p170_p4 = scmp.ge.s32.totalorder %s173_s22, 2  }
  0x18   : >> { %409 = vmatpush3.bf16.msra.mxu0 %v408_v8 }
  0x85   : >> { %v181_v10 = vpop.permute.xlu0 %180 }
  0x86   : >> { %402 = vmatmul.mubr.msk.f32.vlgmr.msra.gmra.mrb[0].mxu0 %vm182_vm1, %v181_v10 }
 0x159   : >> { %v251_v12 = vpop.f32.mrb[0].mxu0 }
 0x15a   : >> { %v255_v13 = vadd.f32 %v251_v12, %v178_v11  ;;  %v403_v14 = vpop.f32.mrb[1].mxu0 }
 0x15c   : >> { %447 = vtanh.f32 %v255_v13  ;;  %v382_v16 = vmul.f32 -1.442695, %v255_v13 }
 0x15e   : >> { %449 = vpow2.f32 %v382_v16 }
 0x166   : >> { %v448_v15 = vpop.eup %447 }
 0x167   : >> { %265 = vrot.lane.b32.xlu0 %v448_v15, %s491_s26 }
 0x168   : >> { %v450_v17 = vpop.eup %449 }
 0x169   : >> { %v259_v18 = vadd.f32 1.0, %v450_v17 }
 0x16b   : >> { %451 = vrcp.f32 %v259_v18 }
 0x175   : >> { %v452_v19 = vpop.eup %451 }
 0x176   : >> { %v263_v22 = vmul.f32 %v477_v4, %v452_v19 }
 0x1d9   : >> { %v266_v20 = vpop.permute.xlu0 %265 }
 0x1da   : >> { %v268_v21 = vmul.f32 %v452_v19, %v266_v20 }
 0x1dc   : >> { %270 = vrot.lane.b32.xlu1 %v268_v21, %s488_s23 }
 0x24e   : >> { %v271_v23 = vpop.permute.xlu1 %270 }
 0x24f   : >> { %v273_v4 = vadd.f32 %v271_v23, %v263_v22  }
 0x251   : >> { %453 = vtanh.f32 %v273_v4 }
 0x25b   : >> { %v454_v24 = vpop.eup %453 }
 0x25c   : >> { %276 = vrot.lane.b32.xlu1 %v454_v24, %s491_s26 }
 0x2ce   : >> { %v277_v25 = vpop.permute.xlu1 %276 }
 0x2cf   : >> { %v279_v5 = vmul.f32 %v452_v19, %v277_v25  }
 0x2d1   : >> { %281 = vrot.lane.b32.xlu0 %v279_v5, %s488_s23 }
 0x33e   : > { %172 = sbr.rel (!%p170_p4) target bundleno = 18 (0x12), region = 70 }
 0x343   : >> { %v282_v26 = vpop.permute.xlu0 %281 }
 0x344   : >> { %286 = vst.msk [vmem:[%s284_s27] sm:$0x3] %vm285_vm2, %v282_v26 }
 0x345 PF: > { %s12_s9 = sadd.s32 1, %s473_s9  }
 0x346   : > { %p9_p5 = scmp.ge.s32.totalorder %s12_s9, 4  }
 0x348   :  { %11 = sbr.rel (!%p9_p5) target bundleno = 1 (0x1), region = 81 }

// kernel: seq2seq_forward.19
= control target key start
LH: loop header
LB: loop body
LE: loop exit
PB: predicated region body
PF: predicated region fallthrough
CT: control target
= control target key end

     0   :  { %v270_v0 = vmov 0.0|0.0   ;;  %vm271_vm0 = vmmov 0   ;;  %v272_v4 = vmov 0.0   ;;  %vm36_vm1 = vcmask 523264   ;;  %s351_s1 = inlined_call_operand.vmem [shape: f32[64,32], index: 1, kind: input, shape index: {}]   ;;  %s352_s3 = inlined_call_operand.vmem [shape: f32[32,64], index: 3, kind: input, shape index: {}]   ;;  %s353_s0 = inlined_call_operand.vmem [shape: f32[4,64], index: 0, kind: input, shape index: {}]   ;;  %s354_s2 = inlined_call_operand.vmem [shape: f32[1,32], index: 2, kind: input, shape index: {}]   ;;  %s355_s4 = inlined_call_operand.vmem [shape: f32[1,64], index: 4, kind: input, shape index: {}]   ;;  %s356_s5 = inlined_call_operand.vmem [shape: f32[4,64], index: 5, kind: output, shape index: {}]  }
   0x1   :  { %249 = vmatprep.subr.bf16.mxu0 %v270_v0  ;;  %v21_v1 = vld [vmem:[%s351_s1] sm:$0xff]  ;;  %v22_v2 = vld [vmem:[%s351_s1 + $0x8] sm:$0xff]  ;;  %v23_v3 = vld [vmem:[%s351_s1 + $0x10] sm:$0xff]  ;;  %235 = vmatprep.mubr.msk.f32.mxu0 %vm271_vm0, %v272_v4  ;;  %vm121_vm2 = vcmask 261120   ;;  %vm195_vm3 = vcmask 519168  }
   0x2   :  { %v250_v5 = vpack.c.bf16 %v22_v2, %v21_v1  ;;  %v24_v6 = vld [vmem:[%s351_s1 + $0x18] sm:$0xff]  ;;  %261 = vmatprep.subr.bf16.mxu1 %v270_v0  ;;  %246 = vmatprep.mubr.msk.f32.mxu1 %vm271_vm0, %v272_v4  ;;  %v110_v8 = vld [vmem:[%s352_s3] sm:$0xff]  ;;  %v111_v9 = vld [vmem:[%s352_s3 + $0x8] sm:$0xff] }
   0x3   :  { %v253_v7 = vpack.c.bf16 %v24_v6, %v23_v3  ;;  %v25_v10 = vld [vmem:[%s351_s1 + $0x20] sm:$0xff]  ;;  %v26_v11 = vld [vmem:[%s351_s1 + $0x28] sm:$0xff]  ;;  %v262_v12 = vpack.c.bf16 %v111_v9, %v110_v8  ;;  %v27_v14 = vld [vmem:[%s351_s1 + $0x30] sm:$0xff] }
   0x4   :  { %251 = vmatpush3.bf16.msra.mxu0 %v250_v5  ;;  %v256_v13 = vpack.c.bf16 %v26_v11, %v25_v10  ;;  %v28_v15 = vld [vmem:[%s351_s1 + $0x38] sm:$0xff]  ;;  %v20_v17 = vld [vmem:[%s353_s0] sm:$0xf]  ;;  %v112_v18 = vld [vmem:[%s352_s3 + $0x10] sm:$0xff] }
   0x5   :  { %252 = vmatprep.subr.bf16.mxu0 %v270_v0  ;;  %263 = vmatpush3.bf16.msra.mxu1 %v262_v12  ;;  %v259_v16 = vpack.c.bf16 %v28_v15, %v27_v14  ;;  %v113_v19 = vld [vmem:[%s352_s3 + $0x18] sm:$0xff]  ;;  %v201_v21 = vld [vmem:[%s354_s2] ss:$0 sm:$0xff] }
   0x6   :  { %264 = vmatprep.subr.bf16.mxu1 %v270_v0  ;;  %v265_v20 = vpack.c.bf16 %v113_v19, %v112_v18  ;;  %v203_v25 = vld [vmem:[%s355_s4] ss:$0 sm:$0xff] }
   0x8   :  { %254 = vmatpush3.bf16.msra.mxu0 %v253_v7 }
   0x9   :  { %255 = vmatprep.subr.bf16.mxu0 %v270_v0  ;;  %266 = vmatpush3.bf16.msra.mxu1 %v265_v20 }
   0xc   :  { %257 = vmatpush3.bf16.msra.mxu0 %v256_v13 }
   0xd   :  { %258 = vmatprep.subr.bf16.mxu0 %v270_v0 }
  0x10   :  { %260 = vmatpush3.bf16.msra.mxu0 %v259_v16 }
  0x13   :  { %236 = vmatmul.mubr.msk.f32.vlgmr.msra.gmra.mrb[0].mxu0 %vm36_vm1, %v20_v17 }
  0xe6   :  { %v106_v22 = vpop.f32.mrb[0].mxu0 }
  0xe7   :  { %v107_v23 = vadd.f32 %v201_v21, %v106_v22  ;;  %v237_v24 = vpop.f32.mrb[1].mxu0 }
  0xe9   :  { %247 = vmatmul.mubr.msk.f32.vlgmr.msra.gmra.mrb[0].mxu1 %vm121_vm2, %v107_v23 }
 0x1bc   :  { %v191_v26 = vpop.f32.mrb[0].mxu1 }
 0x1bd   :  { %v192_v27 = vadd.f32 %v203_v25, %v191_v26  ;;  %v248_v28 = vpop.f32.mrb[1].mxu1 }
 0x1bf   :  { %196 = vst.msk [vmem:[%s356_s5] sm:$0xf] %vm195_vm3, %v192_v27 }

// kernel: seq2seq_forward.20
= control target key start
LH: loop header
LB: loop body
LE: loop exit
PB: predicated region body
PF: predicated region fallthrough
CT: control target
= control target key end

     0   :  { %vm25_vm0 = vcmask 130048   ;;  %s172_s1 = inlined_call_operand.vmem [shape: f32[16,128], index: 1, kind: input, shape index: {}]   ;;  %s173_s0 = inlined_call_operand.vmem [shape: f32[16,16], index: 0, kind: input, shape index: {}]   ;;  %s174_s2 = inlined_call_operand.vmem [shape: f32[1,128], index: 2, kind: input, shape index: {}]   ;;  %s175_s3 = inlined_call_operand.vmem [shape: f32[16,128], index: 3, kind: output, shape index: {}]  }
   0x1   :  { %v16_v0 = vld [vmem:[%s172_s1] sm:$0xff]  ;;  %v17_v1 = vld [vmem:[%s172_s1 + $0x8] sm:$0xff] }
   0x2   :  { %v14_v2 = vld [vmem:[%s173_s0] sm:$0xff]  ;;  %v127_v3 = vpack.c.bf16 %v17_v1, %v16_v0  ;;  %v15_v4 = vld [vmem:[%s173_s0 + $0x8] sm:$0xff] }
   0x3   :  { %124 = vmatprep.mubr.msk.f32.mxu0 %vm25_vm0, %v14_v2  ;;  %v113_v5 = vld [vmem:[%s174_s2] ss:$0 sm:$0xff] }
   0x4   :  { %128 = vmatprep.subr.bf16.mxu0 %v127_v3 }
   0x5   :  { %130 = vmatpush3.bf16.msra.mxu0 %v127_v3 }
   0x8   :  { %125 = vmatmul.mubr.msk.f32.vlgmr.msra.gmra.mrb[0].mxu0 %vm25_vm0, %v15_v4 }
  0xdb   :  { %v126_v6 = vpop.f32.mrb[0].mxu0 }
  0xdc   :  { %v104_v7 = vadd.f32 %v126_v6, %v113_v5  ;;  %v98_v8 = vpop.f32.mrb[1].mxu0 }
  0xdd   :  { %v99_v9 = vadd.f32 %v113_v5, %v98_v8 }
  0xde   :  { %108 = vst [vmem:[%s175_s3 + $0x8] sm:$0xff] %v104_v7 }
  0xdf   :  { %107 = vst [vmem:[%s175_s3] sm:$0xff] %v99_v9 }

// kernel: seq2seq_forward.21
= control target key start
LH: loop header
LB: loop body
LE: loop exit
PB: predicated region body
PF: predicated region fallthrough
CT: control target
= control target key end

     0   :  { %v1113_v0 = vmov 0   ;;  %v62_v32 = vlaneseq  ;;  %v1336_v37 = vmov 0.0   ;;  %v1338_v38 = vmov 0.0   ;;  %s1494_s3 = inlined_call_operand.vmem [shape: s32[2,1], index: 3, kind: input, shape index: {}]   ;;  %s1495_s1 = inlined_call_operand.vmem [shape: f32[2,2,32], index: 1, kind: input, shape index: {}]   ;;  %s1496_s2 = inlined_call_operand.vmem [shape: f32[2,2,32], index: 2, kind: input, shape index: {}]   ;;  %s1497_s4 = inlined_call_operand.vmem [shape: f32[64,128], index: 4, kind: input, shape index: {}]   ;;  %s1498_s0 = inlined_call_operand.vmem [shape: f32[8,2,128], index: 0, kind: input, shape index: {}]   ;;  %s1499_s9 = inlined_call_operand.vmem [shape: f32[8,2,30], index: 9, kind: output, shape index: {}]   ;;  %s1500_s5 = inlined_call_operand.vmem [shape: f32[64,128], index: 5, kind: input, shape index: {}]   ;;  %s1501_s6 = inlined_call_operand.vmem [shape: f32[1,128], index: 6, kind: input, shape index: {}]   ;;  %s1502_s7 = inlined_call_operand.vmem [shape: f32[64,30], index: 7, kind: input, shape index: {}]   ;;  %s1503_s8 = inlined_call_operand.vmem [shape: f32[1,30], index: 8, kind: input, shape index: {}]  }
   0x1   :  { %1036 = vset.pattern.permute.xlu0 %v1113_v0  ;;  %v64_v1 = vld [vmem:[%s1494_s3] sm:$0x3]  ;;  %v1181_v3 = vld [vmem:[%s1495_s1 + $0x2] sm:$0x3]   ;;  %v1201_v7 = vld [vmem:[%s1497_s4 + $0x8] sm:$0xff]  ;;  %v1340_v39 = vmov 0.0  }
   0x2   :  { %66 = vperm.xlu0 %1036, %v64_v1   ;;  %v1176_v2 = vld [vmem:[%s1495_s1] sm:$0x3]   ;;  %v1196_v6 = vld [vmem:[%s1496_s2 + $0x2] sm:$0x3]  ;;  %v1206_v8 = vld [vmem:[%s1497_s4 + $0x10] sm:$0xff]  ;;  %v1324_v33 = vand.u32 127, %v62_v32  ;;  %v1504_v35 = vmov %v1181_v3 }
   0x3   :  { %v1186_v4 = vld [vmem:[%s1497_s4] sm:$0xff]  ;;  %v1211_v9 = vld [vmem:[%s1497_s4 + $0x18] sm:$0xff]  ;;  %v1221_v11 = vld [vmem:[%s1497_s4 + $0x28] sm:$0xff]  ;;  %v1505_v36 = vmov %v1176_v2  ;;  %v1342_v40 = vmov 0.0  }
   0x4   :  { %v1191_v5 = vld [vmem:[%s1496_s2] sm:$0x3]  ;;  %v1226_v12 = vld [vmem:[%s1497_s4 + $0x30] sm:$0xff]  ;;  %v1231_v13 = vld [vmem:[%s1497_s4 + $0x38] sm:$0xff] }
   0x5   :  { %v1216_v10 = vld [vmem:[%s1497_s4 + $0x20] sm:$0xff]  ;;  %v1241_v15 = vld [vmem:[%s1500_s5 + $0x8] sm:$0xff]  ;;  %v1246_v16 = vld [vmem:[%s1500_s5 + $0x10] sm:$0xff] }
   0x6   :  { %v1236_v14 = vld [vmem:[%s1500_s5] sm:$0xff]  ;;  %v1251_v17 = vld [vmem:[%s1500_s5 + $0x18] sm:$0xff]  ;;  %v1261_v19 = vld [vmem:[%s1500_s5 + $0x28] sm:$0xff] }
   0x7   :  { %v1256_v18 = vld [vmem:[%s1500_s5 + $0x20] sm:$0xff]  ;;  %v1266_v20 = vld [vmem:[%s1500_s5 + $0x30] sm:$0xff]  ;;  %v1271_v21 = vld [vmem:[%s1500_s5 + $0x38] sm:$0xff] }
   0x8   :  { %v1276_v22 = vld [vmem:[%s1501_s6] ss:$0 sm:$0xff]  ;;  %v1286_v24 = vld [vmem:[%s1502_s7 + $0x8] sm:$0xff]  ;;  %v1291_v25 = vld [vmem:[%s1502_s7 + $0x10] sm:$0xff] }
   0x9   :  { %v1281_v23 = vld [vmem:[%s1502_s7] sm:$0xff]  ;;  %v1296_v26 = vld [vmem:[%s1502_s7 + $0x18] sm:$0xff]  ;;  %v1306_v28 = vld [vmem:[%s1502_s7 + $0x28] sm:$0xff] }
   0xa   :  { %v1301_v27 = vld [vmem:[%s1502_s7 + $0x20] sm:$0xff]  ;;  %v1311_v29 = vld [vmem:[%s1502_s7 + $0x30] sm:$0xff]  ;;  %v1316_v30 = vld [vmem:[%s1502_s7 + $0x38] sm:$0xff]  ;;  %s1344_s7 = smov 0  }
   0xb   :  { %v1321_v31 = vld [vmem:[%s1503_s8] ss:$0 sm:$0xff] }
  0x81   :  { %v1326_v34 = vpop.permute.xlu0 %66 }
  0x82   :  { %vm68_vm0 = vcmp.ge.s32.totalorder %v1324_v33, %v1326_v34 }
  0x83 LB: > { %v938_v41 = vpack.c.bf16 %v1201_v7, %v1186_v4  ;;  %v1114_v42 = vmov 0.0|0.0   ;;  %s1115_s8 = smov 64   ;;  %v941_v43 = vpack.c.bf16 %v1211_v9, %v1206_v8  ;;  %vm1116_vm1 = vmmov 0   ;;  %s809_s3 = sshll.u32 %s1111_s7, 1  ;;  %s1111_s7 = sphi %s1344_s7, %s74_s7   ;;  %v1107_v40 = vphi %v1342_v40, %v1409_v40   ;;  %v1103_v39 = vphi %v1340_v39, %v1391_v39   ;;  %v1099_v38 = vphi %v1338_v38, %v1429_v38   ;;  %v1095_v37 = vphi %v1336_v37, %v1424_v37   ;;  %v1091_v36 = vphi %v1505_v36, %v606_v36   ;;  %v1087_v35 = vphi %v1504_v35, %v681_v35  }
  0x84   : > { %937 = vmatprep.subr.bf16.mxu0 %v1114_v42  ;;  %949 = vmatprep.subr.bf16.mxu1 %v1114_v42  ;;  %v1117_v44 = vmov 0.0   ;;  %v944_v45 = vpack.c.bf16 %v1221_v11, %v1216_v10  ;;  %v947_v46 = vpack.c.bf16 %v1231_v13, %v1226_v12  ;;  %v86_v47 = vrot.slane %v1087_v35, 7  ;;  %s82_s21 = scalar_lea.vmem %s1498_s0, %s809_s3  ;;  %s1118_s1 = smov 32  }
  0x85   : > { %91 = vrot.lane.b32.xlu0 %v1107_v40, %s1115_s8  ;;  %939 = vmatpush3.bf16.msra.mxu0 %v938_v41  ;;  %vm87_vm2 = vcmask 1041409   ;;  %vm94_vm3 = vcmask 261120   ;;  %vm96_vm4 = vcmask 523264   ;;  %v83_v51 = vld [vmem:[%s82_s21] sm:$0x3]  ;;  %v950_v0 = vpack.c.bf16 %v1241_v15, %v1236_v14  ;;  %s775_s24 = scalar_lea.vmem %s1499_s9, %s809_s3  ;;  %s74_s7 = sadd.s32 1, %s1111_s7  }
  0x86   : > { %940 = vmatprep.subr.bf16.mxu0 %v1114_v42  ;;  %876 = vmatprep.mubr.msk.f32.mxu0 %vm1116_vm1, %v1117_v44  ;;  %v88_v48 = vsel %vm87_vm2, %v86_v47, %v1091_v36  ;;  %v953_v1 = vpack.c.bf16 %v1251_v17, %v1246_v16  ;;  %v956_v35 = vpack.c.bf16 %v1261_v19, %v1256_v18  ;;  %vm498_vm5 = vcmask 9216   ;;  %p71_p0 = scmp.ge.s32.totalorder %s74_s7, 8  }
  0x87   : > { %895 = vmatprep.mubr.msk.f32.mxu1 %vm1116_vm1, %v1117_v44  ;;  %951 = vmatpush3.bf16.msra.mxu1 %v950_v0  ;;  %v959_v40 = vpack.c.bf16 %v1271_v21, %v1266_v20  ;;  %vm536_vm6 = vcmask 1041408   ;;  %vm533_vm7 = vcmask 15360   ;;  %vm776_vm8 = vcmask 238592  }
  0x88   : > { %952 = vmatprep.subr.bf16.mxu1 %v1114_v42 }
  0x89   : > { %942 = vmatpush3.bf16.msra.mxu0 %v941_v43 }
  0x8a   : > { %943 = vmatprep.subr.bf16.mxu0 %v1114_v42 }
  0x8b   : > { %954 = vmatpush3.bf16.msra.mxu1 %v953_v1 }
  0x8c   : > { %955 = vmatprep.subr.bf16.mxu1 %v1114_v42 }
  0x8d   : > { %945 = vmatpush3.bf16.msra.mxu0 %v944_v45 }
  0x8e   : > { %946 = vmatprep.subr.bf16.mxu0 %v1114_v42 }
  0x8f   : > { %957 = vmatpush3.bf16.msra.mxu1 %v956_v35 }
  0x90   : > { %958 = vmatprep.subr.bf16.mxu1 %v1114_v42 }
  0x91   : > { %948 = vmatpush3.bf16.msra.mxu0 %v947_v46 }
  0x92   : > { %961 = vmatprep.subr.bf16.mxu0 %v1114_v42 }
  0x93   : > { %960 = vmatpush3.bf16.msra.mxu1 %v959_v40 }
  0x94   : > { %898 = vmatprep.subr.mxu1 %v1117_v44 }
  0xf7   : > { %v92_v49 = vpop.permute.xlu0 %91 }
  0xf8   : > { %v95_v50 = vsel %vm94_vm3, %v88_v48, %v92_v49 }
  0xf9   : > { %877 = vmatmul.mubr.msk.f32.vlgmr.msra.gmra.mrb[0].mxu0 %vm96_vm4, %v95_v50 }
  0xfa   : > { %934 = vmatprep.mubr.msk.f32.mxu0 %vm1116_vm1, %v1117_v44 }
 0x1cc   : > { %v166_v52 = vpop.f32.mrb[0].mxu0 }
 0x1cd   : > { %v170_v53 = vadd.f32 %v166_v52, %v83_v51  ;;  %v878_v54 = vpop.f32.mrb[1].mxu0 }
 0x1cf   : > { %1037 = vtanh.f32 %v170_v53  ;;  %v811_v56 = vmul.f32 -1.442695, %v170_v53 }
 0x1d1   : > { %1039 = vpow2.f32 %v811_v56 }
 0x1d9   : > { %v1038_v55 = vpop.eup %1037 }
 0x1da   : > { %180 = vrot.lane.b32.xlu0 %v1038_v55, %s1115_s8 }
 0x1db   : > { %v1040_v57 = vpop.eup %1039 }
 0x1dc   : > { %v174_v58 = vadd.f32 1.0, %v1040_v57 }
 0x1de   : > { %1041 = vrcp.f32 %v174_v58 }
 0x1e8   : > { %v1042_v59 = vpop.eup %1041 }
 0x1e9   : > { %v178_v62 = vmul.f32 %v1103_v39, %v1042_v59 }
 0x24c   : > { %v181_v60 = vpop.permute.xlu0 %180 }
 0x24d   : > { %v183_v61 = vmul.f32 %v1042_v59, %v181_v60 }
 0x24f   : > { %185 = vrot.lane.b32.xlu1 %v183_v61, %s1118_s1 }
 0x2c1   : > { %v186_v63 = vpop.permute.xlu1 %185 }
 0x2c2   : > { %v1391_v39 = vadd.f32 %v186_v63, %v178_v62   ;;  %v312_v62 = vshrl.u32 %v62_v32, 7 }
 0x2c4   : > { %1043 = vtanh.f32 %v1391_v39  ;;  %v332_v35 = vsub.s32 0, %v312_v62 }
 0x2ce   : > { %v1044_v36 = vpop.eup %1043 }
 0x2cf   : > { %191 = vrot.lane.b32.xlu1 %v1044_v36, %s1115_s8 }
 0x2d3   : > { %200 = vrot.lane.b32.xlu1 %v1099_v38, %s1115_s8 }
 0x341   : > { %v192_v41 = vpop.permute.xlu1 %191 }
 0x342   : > { %v1409_v40 = vmul.f32 %v1042_v59, %v192_v41   ;;  %v1119_v59 = vmov 1966171168  }
 0x343   : > { %v309_v60 = vunpack.c.l.s4 %v1119_v59 }
 0x344   : > { %196 = vrot.lane.b32.xlu0 %v1409_v40, %s1118_s1 }
 0x345   : > { %v201_v43 = vpop.permute.xlu1 %200  ;;  %v310_v61 = vunpack.c.0.s8 %v309_v60 }
 0x347   : > { %v313_v63 = vsub.s32 %v310_v61, %v312_v62 }
 0x3b6   : > { %v197_v45 = vpop.permute.xlu0 %196 }
 0x3b7   : > { %v203_v46 = vsel %vm94_vm3, %v197_v45, %v201_v43 }
 0x3b8   : > { %896 = vmatmul.mubr.msk.f32.vlgmr.msra.gmra.mrb[0].mxu1 %vm96_vm4, %v203_v46 }
 0x3b9   : > { %899 = vmatpush3.xpose.msk.msra.mxu1 %vm94_vm3, %v1176_v2  ;;  %900 = vmatprep.mubr.msk.f32.mxu1 %vm1116_vm1, %v1117_v44 }
 0x3ba   : > { %903 = vmatprep.subr.mxu1 %v1117_v44 }
 0x48b   : > { %v279_v38 = vpop.f32.mrb[0].mxu1 }
 0x48c   : > { %v280_v47 = vadd.f32 %v1276_v22, %v279_v38  ;;  %v897_v48 = vpop.f32.mrb[1].mxu1 }
 0x48e   : > { %1045 = vtanh.f32 %v280_v47  ;;  %v814_v50 = vmul.f32 -1.442695, %v280_v47 }
 0x490   : > { %1047 = vpow2.f32 %v814_v50 }
 0x498   : > { %v1046_v49 = vpop.eup %1045 }
 0x499   : > { %292 = vrot.lane.b32.xlu0 %v1046_v49, %s1115_s8 }
 0x49a   : > { %v1048_v51 = vpop.eup %1047 }
 0x49b   : > { %v286_v52 = vadd.f32 1.0, %v1048_v51 }
 0x49d   : > { %1049 = vrcp.f32 %v286_v52 }
 0x4a7   : > { %v1050_v53 = vpop.eup %1049 }
 0x4a8   : > { %v290_v56 = vmul.f32 %v1095_v37, %v1050_v53 }
 0x50b   : > { %v293_v54 = vpop.permute.xlu0 %292 }
 0x50c   : > { %v295_v55 = vmul.f32 %v1050_v53, %v293_v54 }
 0x50e   : > { %297 = vrot.lane.b32.xlu1 %v295_v55, %s1118_s1 }
 0x580   : > { %v298_v57 = vpop.permute.xlu1 %297 }
 0x581   : > { %v1424_v37 = vadd.f32 %v298_v57, %v290_v56  }
 0x583   : > { %1051 = vtanh.f32 %v1424_v37 }
 0x58d   : > { %v1052_v58 = vpop.eup %1051 }
 0x58e   : > { %303 = vrot.lane.b32.xlu0 %v1052_v58, %s1115_s8 }
 0x600   : > { %v304_v0 = vpop.permute.xlu0 %303 }
 0x601   : > { %v1429_v38 = vmul.f32 %v1050_v53, %v304_v0  }
 0x603   : > { %v314_v1 = vrot.slane %v1429_v38, %v313_v63 }
 0x605   : > { %v315_v36 = vcombine.high %v314_v1, %v314_v1  ;;  %v322_v41 = vrot.slane %v314_v1, %v313_v63 }
 0x607   : > { %v333_v43 = vrot.slane %v322_v41, %v332_v35  ;;  %v329_v45 = vrot.slane %v315_v36, %v313_v63 }
 0x609   : > { %334 = vrot.lane.b32.xlu1 %v333_v43, %s1118_s1  ;;  %v414_v46 = vrot.slane %v329_v45, %v332_v35  ;;  %v962_v45 = vpack.c.bf16 %v1286_v24, %v1281_v23 }
 0x60b   : > { %415 = vrot.lane.b32.xlu0 %v414_v46, %s1118_s1  ;;  %963 = vmatpush3.bf16.msra.mxu0 %v962_v45  ;;  %v965_v46 = vpack.c.bf16 %v1296_v26, %v1291_v25 }
 0x60c   : > { %964 = vmatprep.subr.bf16.mxu0 %v1114_v42 }
 0x60f   : > { %966 = vmatpush3.bf16.msra.mxu0 %v965_v46 }
 0x610   : > { %967 = vmatprep.subr.bf16.mxu0 %v1114_v42 }
 0x67b   : > { %v335_v47 = vpop.permute.xlu1 %334 }
 0x67c   : > { %901 = vmatmul.mubr.msk.f32.vlgmr.msra.gmra.mrb[2].mxu1 %vm94_vm3, %v335_v47  ;;  %v968_v47 = vpack.c.bf16 %v1306_v28, %v1301_v27 }
 0x67d   : > { %904 = vmatpush3.xpose.msk.msra.mxu1 %vm94_vm3, %v1181_v3  ;;  %905 = vmatprep.mubr.msk.f32.mxu1 %vm1116_vm1, %v1117_v44  ;;  %v416_v48 = vpop.permute.xlu0 %415 }
 0x67e   : > { %908 = vmatprep.subr.mxu1 %v1117_v44  ;;  %969 = vmatpush3.bf16.msra.mxu0 %v968_v47 }
 0x67f   : > { %970 = vmatprep.subr.bf16.mxu0 %v1114_v42 }
 0x680   : > { %906 = vmatmul.mubr.msk.f32.vlgmr.msra.gmra.mrb[4].mxu1 %vm94_vm3, %v416_v48 }
 0x681   : > { %910 = vmatprep.mubr.msk.f32.mxu1 %vm1116_vm1, %v1117_v44  ;;  %909 = vmatpush3.msk.msra.mxu1 %vm536_vm6, %v1191_v5 }
 0x682   : > { %913 = vmatprep.subr.mxu1 %v1117_v44 }
 0x74f   : > { %v407_v49 = vpop.f32.mrb[2].mxu1 }
 0x750   : > { %v902_v50 = vpop.f32.mrb[3].mxu1 }
 0x753   : > { %v488_v51 = vpop.f32.mrb[4].mxu1 }
 0x754   : > { %v494_v52 = vrot.slane %v488_v51, 7  ;;  %v907_v53 = vpop.f32.mrb[5].mxu1 }
 0x756   : > { %v495_v54 = vsel %vm87_vm2, %v494_v52, %v407_v49 }
 0x757   : > { %v497_v55 = vsel %vm68_vm0, -1e-09, %v495_v54 }
 0x758   : > { %v499_v56 = vsel %vm498_vm5, %v497_v55, -inf }
 0x759   : > { %500 = vmax.xlane.f32.xlu1 %v499_v56 }
 0x7e6   : > { %v501_v57 = vpop.xlane.xlu1 %500 }
 0x7e7   : > { %v502_v58 = vsub.f32 %v497_v55, %v501_v57 }
 0x7e9   : > { %v503_v59 = vmul.f32 1.442695, %v502_v58 }
 0x7eb   : > { %1053 = vpow2.f32 %v503_v59 }
 0x7f5   : > { %v1054_v60 = vpop.eup %1053 }
 0x7f6   : > { %v505_v61 = vsel %vm498_vm5, %v1054_v60, 0.0 }
 0x7f7   : > { %506 = vadd.xlane.f32.xlu0 %v505_v61 }
 0x80d   : > { %685 = vrot.lane.b32.xlu0 %v1429_v38, %s1118_s1 }
 0x884   : > { %v507_v62 = vpop.xlane.xlu0 %506 }
 0x885   : > { %1055 = vrcp.f32 %v507_v62 }
 0x888   : > { %v686_v51 = vpop.permute.xlu0 %685 }
 0x88f   : > { %v1056_v0 = vpop.eup %1055 }
 0x890   : > { %v509_v1 = vmul.f32 %v1056_v0, %v1054_v60 }
 0x892   : > { %v517_v35 = vrot.slane %v509_v1, %v313_v63 }
 0x894   : > { %v525_v36 = vrot.slane %v517_v35, %v313_v63  ;;  %v518_v41 = vcombine.high %v517_v35, %v517_v35 }
 0x896   : > { %911 = vmatmul.mubr.msk.f32.vlgmr.msra.gmra.mrb[6].mxu1 %vm533_vm7, %v525_v36  ;;  %v532_v43 = vrot.slane %v518_v41, %v313_v63 }
 0x897   : > { %914 = vmatpush3.msk.msra.mxu1 %vm536_vm6, %v1196_v6  ;;  %915 = vmatprep.mubr.msk.f32.mxu1 %vm1116_vm1, %v1117_v44  ;;  %v971_v44 = vpack.c.bf16 %v1316_v30, %v1311_v29 }
 0x899   : > { %972 = vmatpush3.bf16.msra.mxu0 %v971_v44 }
 0x89a   : > { %916 = vmatmul.mubr.msk.f32.vlgmr.msra.gmra.mrb[8].mxu1 %vm533_vm7, %v532_v43 }
 0x969   : > { %v606_v36 = vpop.f32.mrb[6].mxu1  }
 0x96a   : > { %v912_v63 = vpop.f32.mrb[7].mxu1 }
 0x96d   : > { %v681_v35 = vpop.f32.mrb[8].mxu1  }
 0x96e   : > { %v690_v48 = vrot.slane %v681_v35, 7  ;;  %v917_v49 = vpop.f32.mrb[9].mxu1 }
 0x970   : > { %v691_v50 = vsel %vm87_vm2, %v690_v48, %v606_v36 }
 0x971   : > { %692 = vrot.lane.b32.xlu1 %v691_v50, %s1118_s1 }
 0x9e3   : > { %v693_v52 = vpop.permute.xlu1 %692 }
 0x9e4   : > { %v695_v53 = vsel %vm94_vm3, %v686_v51, %v693_v52 }
 0x9e5   : > { %935 = vmatmul.mubr.msk.f32.vlgmr.msra.gmra.mrb[2].mxu0 %vm96_vm4, %v695_v53 }
 0xab5   :  { %73 = sbr.rel (!%p71_p0) target bundleno = 131 (0x83), region = 65 }
 0xab8   : > { %v771_v42 = vpop.f32.mrb[2].mxu0 }
 0xab9   : > { %v772_v54 = vadd.f32 %v1321_v31, %v771_v42  ;;  %v936_v55 = vpop.f32.mrb[3].mxu0 }
 0xabb   : > { %777 = vst.msk [vmem:[%s775_s24] sm:$0x3] %vm776_vm8, %v772_v54 }

</bundles_post_ra>
